<compile_context>
chip_gen: v7x
topology: tpu7x:2x2x1
jax: 0.10.0
libtpu: 0.0.40
codegen_flags: <defaults>
</compile_context>

<pallas_src>
import jax
import jax.numpy as jnp
from jax.experimental import pallas as pl
from jax.experimental.pallas import tpu as pltpu

BN_EPS = 1e-5
LEAKY_SLOPE = 0.01   # F.leaky_relu default negative_slope

# Padded (lane-friendly) dimensions.
H1 = 128             # linear1 out (64 padded -> 128)
H2 = 256             # 248 padded -> 256 (linear2 out / complex1 in / complex2 out / linear3 in)
HC = 512             # linear_complex1 out
OUT_PAD = 128        # final output 2 padded -> 128 lanes
N_OUT = 2

# Packed bias / BN-affine slab layout: one (16, 512) f32 array, row r holds:
#   0: b1[:128]  1: b2[:256]  2: bc1[:512]  3: g1[:512]  4: be1[:512]
#   5: bc2[:256] 6: g2[:256]  7: be2[:256]  8: b3[:128]  (rows 9-15 zero pad)
BIAS_ROWS = 16
BIAS_COLS = 512


def dqn_kernel(
    x_ref, w1_ref, w2_ref, bias_ref,          # auto-staged VMEM inputs
    wc1_hbm, wc2_hbm, w3_hbm,                 # raw HBM refs (pl.ANY)
    o_ref,                                    # output
    wc1_buf, wc2_buf, w3_buf, sem,            # VMEM scratch + DMA semaphores
):
    # Kick off the big-weight DMAs immediately so they overlap layers 1-2.
    cp_wc1 = pltpu.make_async_copy(wc1_hbm, wc1_buf, sem.at[0])
    cp_wc2 = pltpu.make_async_copy(wc2_hbm, wc2_buf, sem.at[1])
    cp_w3 = pltpu.make_async_copy(w3_hbm, w3_buf, sem.at[2])
    cp_wc1.start()
    cp_wc2.start()
    cp_w3.start()

    # Static views into the packed f32 bias / BN-affine slab (single DMA'd input).
    b1 = bias_ref[0:1, 0:H1]
    b2 = bias_ref[1:2, 0:H2]
    bc1 = bias_ref[2:3, 0:HC]
    g1 = bias_ref[3:4, 0:HC]
    be1 = bias_ref[4:5, 0:HC]
    bc2 = bias_ref[5:6, 0:H2]
    g2 = bias_ref[6:7, 0:H2]
    be2 = bias_ref[7:8, 0:H2]
    b3 = bias_ref[8:9, 0:OUT_PAD]

    def mm(a_f32_or_bf16, w, b):
        return (
            jnp.dot(a_f32_or_bf16.astype(jnp.bfloat16), w,
                    preferred_element_type=jnp.float32)
            + b
        )

    def batch_norm(h, g, be):
        mean = jnp.mean(h, axis=0, keepdims=True)
        mean_sq = jnp.mean(h * h, axis=0, keepdims=True)
        var = jnp.maximum(mean_sq - mean * mean, 0.0)   # guard cancellation
        scale = g * jax.lax.rsqrt(var + BN_EPS)
        return h * scale + (be - mean * scale)

    x = x_ref[...]                                       # already bf16

    # linear1 + relu
    h = jnp.maximum(mm(x, w1_ref[...], b1), 0.0)

    # linear2 + leaky_relu
    h = mm(h, w2_ref[...], b2)
    h = jnp.maximum(h, LEAKY_SLOPE * h)

    # linear_complex1 + relu + bn1
    cp_wc1.wait()
    h = jnp.maximum(mm(h, wc1_buf[...], bc1), 0.0)
    h = batch_norm(h, g1, be1)

    # linear_complex2 + relu + bn2
    cp_wc2.wait()
    h = jnp.maximum(mm(h, wc2_buf[...], bc2), 0.0)
    h = batch_norm(h, g2, be2)

    # linear3 (lane-dense padded output; wrapper slices [:, :2])
    cp_w3.wait()
    out = mm(h, w3_buf[...], b3)
    o_ref[...] = out.astype(o_ref.dtype)


def dqn_forward(x, params):
    """x: (B, input_shape) float32. Returns (B, 2) float32."""
    B = x.shape[0]
    x_bf16 = x.astype(jnp.bfloat16)

    vmem_spec = pl.BlockSpec(memory_space=pltpu.MemorySpace.VMEM)
    hbm_spec = pl.BlockSpec(memory_space=pl.ANY)

    out_padded = pl.pallas_call(
        dqn_kernel,
        out_shape=jax.ShapeDtypeStruct((B, OUT_PAD), jnp.float32),
        in_specs=[vmem_spec, vmem_spec, vmem_spec, vmem_spec,
                  hbm_spec, hbm_spec, hbm_spec],
        out_specs=vmem_spec,
        scratch_shapes=[
            pltpu.VMEM((H2, HC), jnp.bfloat16),       # wc1 buffer
            pltpu.VMEM((HC, H2), jnp.bfloat16),       # wc2 buffer
            pltpu.VMEM((H2, OUT_PAD), jnp.bfloat16),  # w3 buffer
            pltpu.SemaphoreType.DMA((3,)),
        ],
    )(x_bf16, params["w1"], params["w2"], params["bias"],
      params["wc1"], params["wc2"], params["w3"])
    return out_padded[:, :N_OUT]


def init_params(key, input_shape):
    """Init mirroring nn.Linear defaults (uniform +-1/sqrt(fan_in)).

    Weights stored as (in, out), zero-padded to lane-friendly sizes, bf16.
    All biases / BN affine params live in one packed (16, 512) f32 slab.
    Padded rows/columns are zero (and BN gamma is zero in padded lanes), so
    results match the unpadded network exactly.
    """
    keys = jax.random.split(key, 10)

    def linear(kw, kb, fan_in, fan_out, pad_in, pad_out):
        bound = 1.0 / jnp.sqrt(float(fan_in))
        w = jax.random.uniform(kw, (fan_in, fan_out), jnp.float32, -bound, bound)
        b = jax.random.uniform(kb, (fan_out,), jnp.float32, -bound, bound)
        w = jnp.pad(w, ((0, pad_in - fan_in), (0, pad_out - fan_out)))
        b = jnp.pad(b, (0, pad_out - fan_out))
        return w.astype(jnp.bfloat16), b

    w1, b1 = linear(keys[0], keys[1], input_shape, 64, input_shape, H1)
    w2, b2 = linear(keys[2], keys[3], 64, 248, H1, H2)
    wc1, bc1 = linear(keys[4], keys[5], 248, 512, H2, HC)
    wc2, bc2 = linear(keys[6], keys[7], 512, 248, HC, H2)
    w3, b3 = linear(keys[8], keys[9], 248, 2, H2, OUT_PAD)

    # BatchNorm affine params (PyTorch defaults gamma=1, beta=0); padded lanes
    # get gamma=0 so they stay exactly zero through BN.
    g1 = jnp.ones((HC,), jnp.float32)
    be1 = jnp.zeros((HC,), jnp.float32)
    g2 = jnp.pad(jnp.ones((248,), jnp.float32), (0, H2 - 248))
    be2 = jnp.zeros((H2,), jnp.float32)

    slab = jnp.zeros((BIAS_ROWS, BIAS_COLS), jnp.float32)

    def put(s, row, vec):
        return s.at[row, : vec.shape[0]].set(vec)

    slab = put(slab, 0, b1)
    slab = put(slab, 1, b2)
    slab = put(slab, 2, bc1)
    slab = put(slab, 3, g1)
    slab = put(slab, 4, be1)
    slab = put(slab, 5, bc2)
    slab = put(slab, 6, g2)
    slab = put(slab, 7, be2)
    slab = put(slab, 8, b3)

    return dict(w1=w1, w2=w2, wc1=wc1, wc2=wc2, w3=w3, bias=slab)


def dqn_reference(x, p):
    """Pure-JAX reference with the same bf16-input / f32-accum matmuls and
    train-mode (batch-stat) BatchNorm as the kernel."""
    slab = p["bias"]
    b1 = slab[0:1, 0:H1]
    b2 = slab[1:2, 0:H2]
    bc1 = slab[2:3, 0:HC]
    g1 = slab[3:4, 0:HC]
    be1 = slab[4:5, 0:HC]
    bc2 = slab[5:6, 0:H2]
    g2 = slab[6:7, 0:H2]
    be2 = slab[7:8, 0:H2]
    b3 = slab[8:9, 0:OUT_PAD]

    def mm(a, w, b):
        return jnp.dot(a.astype(jnp.bfloat16), w,
                       preferred_element_type=jnp.float32) + b

    def bn(h, g, be):
        m = jnp.mean(h, axis=0, keepdims=True)
        v = jnp.maximum(jnp.mean(h * h, axis=0, keepdims=True) - m * m, 0.0)
        scale = g * jax.lax.rsqrt(v + BN_EPS)
        return h * scale + (be - m * scale)

    h = jnp.maximum(mm(x, p["w1"], b1), 0.0)
    h = mm(h, p["w2"], b2)
    h = jnp.maximum(h, LEAKY_SLOPE * h)
    h = bn(jnp.maximum(mm(h, p["wc1"], bc1), 0.0), g1, be1)
    h = bn(jnp.maximum(mm(h, p["wc2"], bc2), 0.0), g2, be2)
    out = mm(h, p["w3"], b3)
    return out[:, :N_OUT]


if __name__ == "__main__":
    B = 8
    INPUT_SHAPE = 16

    key = jax.random.PRNGKey(0)
    k_x, k_p = jax.random.split(key)
    x = jax.random.normal(k_x, (B, INPUT_SHAPE), jnp.float32)
    params = init_params(k_p, INPUT_SHAPE)

    out = dqn_forward(x, params)
    out = jax.block_until_ready(out)

    ref = dqn_reference(x, params)
    assert out.shape == (B, N_OUT), out.shape
    max_err = float(jnp.max(jnp.abs(out - ref)))
    assert jnp.allclose(out, ref, atol=2e-3, rtol=2e-3), max_err
    print("KERNEL_OK")
</pallas_src>

<mosaic_0001>
module attributes {stable_mosaic.version = 11 : i64} {
  func.func @dqn_kernel(%arg0: memref<8x16xbf16, #tpu.memory_space<vmem>>, %arg1: memref<16x128xbf16, #tpu.memory_space<vmem>>, %arg2: memref<128x256xbf16, #tpu.memory_space<vmem>>, %arg3: memref<16x512xf32, #tpu.memory_space<vmem>>, %arg4: memref<256x512xbf16, #tpu.memory_space<any>>, %arg5: memref<512x256xbf16, #tpu.memory_space<any>>, %arg6: memref<256x128xbf16, #tpu.memory_space<any>>, %arg7: memref<8x128xf32, #tpu.memory_space<vmem>>, %arg8: memref<256x512xbf16, #tpu.memory_space<vmem>>, %arg9: memref<512x256xbf16, #tpu.memory_space<vmem>>, %arg10: memref<256x128xbf16, #tpu.memory_space<vmem>>, %arg11: memref<3x!tpu.dma_semaphore, #tpu.memory_space<semaphore_mem>>) attributes {dimension_semantics = [], scalar_prefetch = 0 : i64, scratch_operands = 4 : i64, tpu.core_type = #tpu.core_type<tc>} {
    %c0_i32 = arith.constant 0 : i32
    %0 = tpu.memref_slice %arg11[%c0_i32] : memref<3x!tpu.dma_semaphore, #tpu.memory_space<semaphore_mem>> -> memref<1x!tpu.dma_semaphore, #tpu.memory_space<semaphore_mem>>
    %1 = tpu.memref_squeeze %0 : memref<1x!tpu.dma_semaphore, #tpu.memory_space<semaphore_mem>> -> memref<!tpu.dma_semaphore, #tpu.memory_space<semaphore_mem>>
    tpu.enqueue_dma source(%arg4 : memref<256x512xbf16, #tpu.memory_space<any>>) target(%arg8 : memref<256x512xbf16, #tpu.memory_space<vmem>>) target_semaphore(%1 : memref<!tpu.dma_semaphore, #tpu.memory_space<semaphore_mem>>)
    %c1_i32 = arith.constant 1 : i32
    %2 = tpu.memref_slice %arg11[%c1_i32] : memref<3x!tpu.dma_semaphore, #tpu.memory_space<semaphore_mem>> -> memref<1x!tpu.dma_semaphore, #tpu.memory_space<semaphore_mem>>
    %3 = tpu.memref_squeeze %2 : memref<1x!tpu.dma_semaphore, #tpu.memory_space<semaphore_mem>> -> memref<!tpu.dma_semaphore, #tpu.memory_space<semaphore_mem>>
    tpu.enqueue_dma source(%arg5 : memref<512x256xbf16, #tpu.memory_space<any>>) target(%arg9 : memref<512x256xbf16, #tpu.memory_space<vmem>>) target_semaphore(%3 : memref<!tpu.dma_semaphore, #tpu.memory_space<semaphore_mem>>)
    %c2_i32 = arith.constant 2 : i32
    %4 = tpu.memref_slice %arg11[%c2_i32] : memref<3x!tpu.dma_semaphore, #tpu.memory_space<semaphore_mem>> -> memref<1x!tpu.dma_semaphore, #tpu.memory_space<semaphore_mem>>
    %5 = tpu.memref_squeeze %4 : memref<1x!tpu.dma_semaphore, #tpu.memory_space<semaphore_mem>> -> memref<!tpu.dma_semaphore, #tpu.memory_space<semaphore_mem>>
    tpu.enqueue_dma source(%arg6 : memref<256x128xbf16, #tpu.memory_space<any>>) target(%arg10 : memref<256x128xbf16, #tpu.memory_space<vmem>>) target_semaphore(%5 : memref<!tpu.dma_semaphore, #tpu.memory_space<semaphore_mem>>)
    %c0 = arith.constant 0 : index
    %c0_0 = arith.constant 0 : index
    %6 = vector.load %arg3[%c0, %c0_0] : memref<16x512xf32, #tpu.memory_space<vmem>>, vector<1x128xf32>
    %c1 = arith.constant 1 : index
    %c0_1 = arith.constant 0 : index
    %7 = vector.load %arg3[%c1, %c0_1] : memref<16x512xf32, #tpu.memory_space<vmem>>, vector<1x256xf32>
    %c2 = arith.constant 2 : index
    %c0_2 = arith.constant 0 : index
    %8 = vector.load %arg3[%c2, %c0_2] : memref<16x512xf32, #tpu.memory_space<vmem>>, vector<1x512xf32>
    %c3 = arith.constant 3 : index
    %c0_3 = arith.constant 0 : index
    %9 = vector.load %arg3[%c3, %c0_3] : memref<16x512xf32, #tpu.memory_space<vmem>>, vector<1x512xf32>
    %c4 = arith.constant 4 : index
    %c0_4 = arith.constant 0 : index
    %10 = vector.load %arg3[%c4, %c0_4] : memref<16x512xf32, #tpu.memory_space<vmem>>, vector<1x512xf32>
    %c5 = arith.constant 5 : index
    %c0_5 = arith.constant 0 : index
    %11 = vector.load %arg3[%c5, %c0_5] : memref<16x512xf32, #tpu.memory_space<vmem>>, vector<1x256xf32>
    %c6 = arith.constant 6 : index
    %c0_6 = arith.constant 0 : index
    %12 = vector.load %arg3[%c6, %c0_6] : memref<16x512xf32, #tpu.memory_space<vmem>>, vector<1x256xf32>
    %c7 = arith.constant 7 : index
    %c0_7 = arith.constant 0 : index
    %13 = vector.load %arg3[%c7, %c0_7] : memref<16x512xf32, #tpu.memory_space<vmem>>, vector<1x256xf32>
    %c8 = arith.constant 8 : index
    %c0_8 = arith.constant 0 : index
    %14 = vector.load %arg3[%c8, %c0_8] : memref<16x512xf32, #tpu.memory_space<vmem>>, vector<1x128xf32>
    %c0_9 = arith.constant 0 : index
    %c0_10 = arith.constant 0 : index
    %15 = vector.load %arg0[%c0_9, %c0_10] : memref<8x16xbf16, #tpu.memory_space<vmem>>, vector<8x16xbf16>
    %c0_11 = arith.constant 0 : index
    %c0_12 = arith.constant 0 : index
    %16 = vector.load %arg1[%c0_11, %c0_12] : memref<16x128xbf16, #tpu.memory_space<vmem>>, vector<16x128xbf16>
    %cst = arith.constant dense<0.000000e+00> : vector<8x128xf32>
    %17 = tpu.matmul %15, %16, %cst {dimension_numbers = #tpu.dot_dimension_numbers<[1], [0], [0], [1], [0, 0, 1, 1], [], []>} : vector<8x16xbf16>, vector<16x128xbf16>, vector<8x128xf32> -> vector<8x128xf32>
    %18 = vector.broadcast %6 : vector<1x128xf32> to vector<8x128xf32>
    %19 = arith.addf %17, %18 : vector<8x128xf32>
    %cst_13 = arith.constant 0.000000e+00 : f32
    %20 = vector.broadcast %cst_13 : f32 to vector<8x128xf32>
    %21 = arith.maximumf %19, %20 : vector<8x128xf32>
    %c0_14 = arith.constant 0 : index
    %c0_15 = arith.constant 0 : index
    %22 = vector.load %arg2[%c0_14, %c0_15] : memref<128x256xbf16, #tpu.memory_space<vmem>>, vector<128x256xbf16>
    %23 = arith.truncf %21 : vector<8x128xf32> to vector<8x128xbf16>
    %cst_16 = arith.constant dense<0.000000e+00> : vector<8x256xf32>
    %24 = tpu.matmul %23, %22, %cst_16 {dimension_numbers = #tpu.dot_dimension_numbers<[1], [0], [0], [1], [0, 0, 1, 1], [], []>} : vector<8x128xbf16>, vector<128x256xbf16>, vector<8x256xf32> -> vector<8x256xf32>
    %25 = vector.broadcast %7 : vector<1x256xf32> to vector<8x256xf32>
    %26 = arith.addf %24, %25 : vector<8x256xf32>
    %cst_17 = arith.constant 0.00999999977 : f32
    %27 = vector.broadcast %cst_17 : f32 to vector<8x256xf32>
    %28 = arith.mulf %27, %26 : vector<8x256xf32>
    %29 = arith.maximumf %26, %28 : vector<8x256xf32>
    %c0_i32_18 = arith.constant 0 : i32
    %30 = tpu.memref_slice %arg11[%c0_i32_18] : memref<3x!tpu.dma_semaphore, #tpu.memory_space<semaphore_mem>> -> memref<1x!tpu.dma_semaphore, #tpu.memory_space<semaphore_mem>>
    %31 = tpu.memref_squeeze %30 : memref<1x!tpu.dma_semaphore, #tpu.memory_space<semaphore_mem>> -> memref<!tpu.dma_semaphore, #tpu.memory_space<semaphore_mem>>
    tpu.wait_dma2 semaphore(%31 : memref<!tpu.dma_semaphore, #tpu.memory_space<semaphore_mem>>) src(%arg4 : memref<256x512xbf16, #tpu.memory_space<any>>) dst(%arg8 : memref<256x512xbf16, #tpu.memory_space<vmem>>)
    %c0_19 = arith.constant 0 : index
    %c0_20 = arith.constant 0 : index
    %32 = vector.load %arg8[%c0_19, %c0_20] : memref<256x512xbf16, #tpu.memory_space<vmem>>, vector<256x512xbf16>
    %33 = arith.truncf %29 : vector<8x256xf32> to vector<8x256xbf16>
    %cst_21 = arith.constant dense<0.000000e+00> : vector<8x512xf32>
    %34 = tpu.matmul %33, %32, %cst_21 {dimension_numbers = #tpu.dot_dimension_numbers<[1], [0], [0], [1], [0, 0, 1, 1], [], []>} : vector<8x256xbf16>, vector<256x512xbf16>, vector<8x512xf32> -> vector<8x512xf32>
    %35 = vector.broadcast %8 : vector<1x512xf32> to vector<8x512xf32>
    %36 = arith.addf %34, %35 : vector<8x512xf32>
    %cst_22 = arith.constant 0.000000e+00 : f32
    %37 = vector.broadcast %cst_22 : f32 to vector<8x512xf32>
    %38 = arith.maximumf %36, %37 : vector<8x512xf32>
    %cst_23 = arith.constant dense<0.000000e+00> : vector<512xf32>
    %39 = vector.multi_reduction <add>, %38, %cst_23 [0] : vector<8x512xf32> to vector<512xf32>
    %40 = vector.shape_cast %39 : vector<512xf32> to vector<1x512xf32>
    %cst_24 = arith.constant 8.000000e+00 : f32
    %41 = vector.broadcast %cst_24 : f32 to vector<1x512xf32>
    %42 = arith.divf %40, %41 : vector<1x512xf32>
    %43 = arith.mulf %38, %38 : vector<8x512xf32>
    %cst_25 = arith.constant dense<0.000000e+00> : vector<512xf32>
    %44 = vector.multi_reduction <add>, %43, %cst_25 [0] : vector<8x512xf32> to vector<512xf32>
    %45 = vector.shape_cast %44 : vector<512xf32> to vector<1x512xf32>
    %cst_26 = arith.constant 8.000000e+00 : f32
    %46 = vector.broadcast %cst_26 : f32 to vector<1x512xf32>
    %47 = arith.divf %45, %46 : vector<1x512xf32>
    %48 = arith.mulf %42, %42 : vector<1x512xf32>
    %49 = arith.subf %47, %48 : vector<1x512xf32>
    %cst_27 = arith.constant 0.000000e+00 : f32
    %50 = vector.broadcast %cst_27 : f32 to vector<1x512xf32>
    %51 = arith.maximumf %49, %50 : vector<1x512xf32>
    %cst_28 = arith.constant 9.99999974E-6 : f32
    %52 = vector.broadcast %cst_28 : f32 to vector<1x512xf32>
    %53 = arith.addf %51, %52 : vector<1x512xf32>
    %54 = math.rsqrt %53 : vector<1x512xf32>
    %55 = arith.mulf %9, %54 : vector<1x512xf32>
    %56 = vector.broadcast %55 : vector<1x512xf32> to vector<8x512xf32>
    %57 = arith.mulf %38, %56 : vector<8x512xf32>
    %58 = arith.mulf %42, %55 : vector<1x512xf32>
    %59 = arith.subf %10, %58 : vector<1x512xf32>
    %60 = vector.broadcast %59 : vector<1x512xf32> to vector<8x512xf32>
    %61 = arith.addf %57, %60 : vector<8x512xf32>
    %c1_i32_29 = arith.constant 1 : i32
    %62 = tpu.memref_slice %arg11[%c1_i32_29] : memref<3x!tpu.dma_semaphore, #tpu.memory_space<semaphore_mem>> -> memref<1x!tpu.dma_semaphore, #tpu.memory_space<semaphore_mem>>
    %63 = tpu.memref_squeeze %62 : memref<1x!tpu.dma_semaphore, #tpu.memory_space<semaphore_mem>> -> memref<!tpu.dma_semaphore, #tpu.memory_space<semaphore_mem>>
    tpu.wait_dma2 semaphore(%63 : memref<!tpu.dma_semaphore, #tpu.memory_space<semaphore_mem>>) src(%arg5 : memref<512x256xbf16, #tpu.memory_space<any>>) dst(%arg9 : memref<512x256xbf16, #tpu.memory_space<vmem>>)
    %c0_30 = arith.constant 0 : index
    %c0_31 = arith.constant 0 : index
    %64 = vector.load %arg9[%c0_30, %c0_31] : memref<512x256xbf16, #tpu.memory_space<vmem>>, vector<512x256xbf16>
    %65 = arith.truncf %61 : vector<8x512xf32> to vector<8x512xbf16>
    %cst_32 = arith.constant dense<0.000000e+00> : vector<8x256xf32>
    %66 = tpu.matmul %65, %64, %cst_32 {dimension_numbers = #tpu.dot_dimension_numbers<[1], [0], [0], [1], [0, 0, 1, 1], [], []>} : vector<8x512xbf16>, vector<512x256xbf16>, vector<8x256xf32> -> vector<8x256xf32>
    %67 = vector.broadcast %11 : vector<1x256xf32> to vector<8x256xf32>
    %68 = arith.addf %66, %67 : vector<8x256xf32>
    %cst_33 = arith.constant 0.000000e+00 : f32
    %69 = vector.broadcast %cst_33 : f32 to vector<8x256xf32>
    %70 = arith.maximumf %68, %69 : vector<8x256xf32>
    %cst_34 = arith.constant dense<0.000000e+00> : vector<256xf32>
    %71 = vector.multi_reduction <add>, %70, %cst_34 [0] : vector<8x256xf32> to vector<256xf32>
    %72 = vector.shape_cast %71 : vector<256xf32> to vector<1x256xf32>
    %cst_35 = arith.constant 8.000000e+00 : f32
    %73 = vector.broadcast %cst_35 : f32 to vector<1x256xf32>
    %74 = arith.divf %72, %73 : vector<1x256xf32>
    %75 = arith.mulf %70, %70 : vector<8x256xf32>
    %cst_36 = arith.constant dense<0.000000e+00> : vector<256xf32>
    %76 = vector.multi_reduction <add>, %75, %cst_36 [0] : vector<8x256xf32> to vector<256xf32>
    %77 = vector.shape_cast %76 : vector<256xf32> to vector<1x256xf32>
    %cst_37 = arith.constant 8.000000e+00 : f32
    %78 = vector.broadcast %cst_37 : f32 to vector<1x256xf32>
    %79 = arith.divf %77, %78 : vector<1x256xf32>
    %80 = arith.mulf %74, %74 : vector<1x256xf32>
    %81 = arith.subf %79, %80 : vector<1x256xf32>
    %cst_38 = arith.constant 0.000000e+00 : f32
    %82 = vector.broadcast %cst_38 : f32 to vector<1x256xf32>
    %83 = arith.maximumf %81, %82 : vector<1x256xf32>
    %cst_39 = arith.constant 9.99999974E-6 : f32
    %84 = vector.broadcast %cst_39 : f32 to vector<1x256xf32>
    %85 = arith.addf %83, %84 : vector<1x256xf32>
    %86 = math.rsqrt %85 : vector<1x256xf32>
    %87 = arith.mulf %12, %86 : vector<1x256xf32>
    %88 = vector.broadcast %87 : vector<1x256xf32> to vector<8x256xf32>
    %89 = arith.mulf %70, %88 : vector<8x256xf32>
    %90 = arith.mulf %74, %87 : vector<1x256xf32>
    %91 = arith.subf %13, %90 : vector<1x256xf32>
    %92 = vector.broadcast %91 : vector<1x256xf32> to vector<8x256xf32>
    %93 = arith.addf %89, %92 : vector<8x256xf32>
    %c2_i32_40 = arith.constant 2 : i32
    %94 = tpu.memref_slice %arg11[%c2_i32_40] : memref<3x!tpu.dma_semaphore, #tpu.memory_space<semaphore_mem>> -> memref<1x!tpu.dma_semaphore, #tpu.memory_space<semaphore_mem>>
    %95 = tpu.memref_squeeze %94 : memref<1x!tpu.dma_semaphore, #tpu.memory_space<semaphore_mem>> -> memref<!tpu.dma_semaphore, #tpu.memory_space<semaphore_mem>>
    tpu.wait_dma2 semaphore(%95 : memref<!tpu.dma_semaphore, #tpu.memory_space<semaphore_mem>>) src(%arg6 : memref<256x128xbf16, #tpu.memory_space<any>>) dst(%arg10 : memref<256x128xbf16, #tpu.memory_space<vmem>>)
    %c0_41 = arith.constant 0 : index
    %c0_42 = arith.constant 0 : index
    %96 = vector.load %arg10[%c0_41, %c0_42] : memref<256x128xbf16, #tpu.memory_space<vmem>>, vector<256x128xbf16>
    %97 = arith.truncf %93 : vector<8x256xf32> to vector<8x256xbf16>
    %cst_43 = arith.constant dense<0.000000e+00> : vector<8x128xf32>
    %98 = tpu.matmul %97, %96, %cst_43 {dimension_numbers = #tpu.dot_dimension_numbers<[1], [0], [0], [1], [0, 0, 1, 1], [], []>} : vector<8x256xbf16>, vector<256x128xbf16>, vector<8x128xf32> -> vector<8x128xf32>
    %99 = vector.broadcast %14 : vector<1x128xf32> to vector<8x128xf32>
    %100 = arith.addf %98, %99 : vector<8x128xf32>
    %c0_44 = arith.constant 0 : index
    %c0_45 = arith.constant 0 : index
    %101 = vector.load %arg7[%c0_44, %c0_45] : memref<8x128xf32, #tpu.memory_space<vmem>>, vector<8x128xf32>
    tpu.vector_store %arg7[%c0_44, %c0_45], %100 {strides = array<i32>} : memref<8x128xf32, #tpu.memory_space<vmem>>, vector<8x128xf32>,
    return
  }
}

</mosaic_0001>

<bundles_post_ra>
// kernel: tpu_custom_call.1
= control target key start
LH: loop header
LB: loop body
LE: loop exit
PB: predicated region body
PF: predicated region fallthrough
CT: control target
= control target key end

     0   :  { %12 = vsyncpa [#allocation7], 0  ;;  %s1665_s0 = inlined_call_operand.hbm [shape: bf16[8,16], index: 0, kind: input, shape index: {}]   ;;  %s1666_s1 = inlined_call_operand.hbm [shape: bf16[16,128], index: 1, kind: input, shape index: {}]   ;;  %s1667_s2 = inlined_call_operand.hbm [shape: bf16[128,256], index: 2, kind: input, shape index: {}]   ;;  %s1668_s3 = inlined_call_operand.hbm [shape: f32[16,512], index: 3, kind: input, shape index: {}]   ;;  %s1669_s4 = inlined_call_operand.hbm [shape: bf16[256,512], index: 4, kind: input, shape index: {}]   ;;  %s1670_s5 = inlined_call_operand.hbm [shape: bf16[512,256], index: 5, kind: input, shape index: {}]   ;;  %s1671_s6 = inlined_call_operand.hbm [shape: bf16[256,128], index: 6, kind: input, shape index: {}]   ;;  %s1672_s7 = inlined_call_operand.hbm [shape: f32[8,128], index: 7, kind: output, shape index: {}]  }
   0x1   :  { %13 = vsyncpa [#allocation10], 0 }
   0x2   :  { %14 = vsyncpa [#allocation13], 0 }
   0x3   :  { %15 = vsyncpa [#allocation8], 0  ;;  %s1392_s24 = smov [#allocation9]   ;;  %s1246_s28 = scalar_lea.hbm %s1666_s1, 128 }
   0x4   :  { %s31_s25 = sshll.u32 %s1392_s24, 4  ;;  %p1247_p0 = scmp.ne.s32.totalorder %s1666_s1, %s1246_s28  ;;  %s32_s25 = int_to_ptr.vmem [resolvable:$true] %s31_s25 }
   0x5   :  { %p1250_p1 = scmp.lt.u32.totalorder %s1246_s28, %s1666_s1 }
   0x7   :  { %p1252_p2 = pnand %p1250_p1, %p1247_p0 }
   0x9   :  { %1255 = shalt.err (!%p1252_p2)
}
   0xa   :  { %s1256_s10 = scalar_lea.vmem %s32_s25, 128  ;;  %p1261_p4 = scmp.lt.s32.totalorder %s32_s25, %s32_s25 }
   0xb   :  { %p1257_p3 = scmp.ne.s32.totalorder %s32_s25, %s1256_s10  ;;  %p1262_p5 = scmp.lt.s32.totalorder %s1256_s10, %s1256_s10 }
   0xd   :  { %p1263_p6 = por %p1262_p5, %p1261_p4 }
   0xf   :  { %p1264_p7 = pnand %p1263_p6, %p1257_p3 }
  0x11   :  { %1267 = shalt.err (!%p1264_p7)
}
  0x12   :  { %s1393_s11 = smov 64   ;;  %s1394_s12 = smov 4  }
  0x13   :  { %37 = dma.hbm_to_vmem [thread:$0]  %s1666_s1, 128, %s32_s25, [#allocation10], %s1393_s11, %s1393_s11, %s1394_s12  }
  0x14   :  { %s1395_s15 = smov [#allocation6]   ;;  %s1396_s17 = smov [#allocation11]  }
  0x15   :  { %s22_s16 = sshll.u32 %s1395_s15, 4  ;;  %s43_s18 = sshll.u32 %s1396_s17, 4  ;;  %s23_s16 = int_to_ptr.vmem [resolvable:$true] %s22_s16  ;;  %s44_s18 = int_to_ptr.vmem [resolvable:$true] %s43_s18 }
  0x16   :  { %s1268_s21 = scalar_lea.hbm %s1665_s0, 64 }
  0x17   :  { %p1269_p8 = scmp.ne.s32.totalorder %s1665_s0, %s1268_s21  ;;  %p1272_p9 = scmp.lt.u32.totalorder %s1268_s21, %s1665_s0 }
  0x19   :  { %p1274_p10 = pnand %p1272_p9, %p1269_p8 }
  0x1b   :  { %1277 = shalt.err (!%p1274_p10)
}
  0x1c   :  { %s1278_s1 = scalar_lea.vmem %s23_s16, 64  ;;  %p1283_p12 = scmp.lt.s32.totalorder %s23_s16, %s23_s16 }
  0x1d   :  { %p1279_p11 = scmp.ne.s32.totalorder %s23_s16, %s1278_s1  ;;  %p1284_p13 = scmp.lt.s32.totalorder %s1278_s1, %s1278_s1 }
  0x1f   :  { %p1285_p0 = por %p1284_p13, %p1283_p12 }
  0x21   :  { %p1286_p1 = pnand %p1285_p0, %p1279_p11 }
  0x23   :  { %1289 = shalt.err (!%p1286_p1)
}
  0x24   :  { %25 = dma.hbm_to_vmem [thread:$0]  %s1665_s0, 64, %s23_s16, [#allocation7]  }
  0x25   :  { %s1290_s30 = scalar_lea.hbm %s1667_s2, 2048 }
  0x26   :  { %p1291_p2 = scmp.ne.s32.totalorder %s1667_s2, %s1290_s30  ;;  %p1294_p3 = scmp.lt.u32.totalorder %s1290_s30, %s1667_s2 }
  0x28   :  { %p1296_p4 = pnand %p1294_p3, %p1291_p2 }
  0x2a   :  { %1299 = shalt.err (!%p1296_p4)
}
  0x2b   :  { %s1300_s14 = scalar_lea.vmem %s44_s18, 2048  ;;  %p1305_p6 = scmp.lt.s32.totalorder %s44_s18, %s44_s18 }
  0x2c   :  { %p1301_p5 = scmp.ne.s32.totalorder %s44_s18, %s1300_s14  ;;  %p1306_p7 = scmp.lt.s32.totalorder %s1300_s14, %s1300_s14 }
  0x2e   :  { %p1307_p8 = por %p1306_p7, %p1305_p6 }
  0x30   :  { %p1308_p9 = pnand %p1307_p8, %p1301_p5 }
  0x32   :  { %1311 = shalt.err (!%p1308_p9)
}
  0x33   :  { %s1397_s0 = smov 128   ;;  %s1398_s15 = smov 8  }
  0x34   :  { %49 = dma.hbm_to_vmem [thread:$0]  %s1667_s2, 2048, %s44_s18, [#allocation10], %s1397_s0, %s1397_s0, %s1398_s15  }
  0x35   :  { %s1399_s19 = smov [#allocation12]   ;;  %s1312_s23 = scalar_lea.hbm %s1668_s3, 1024 }
  0x36   :  { %s55_s20 = sshll.u32 %s1399_s19, 4  ;;  %p1313_p10 = scmp.ne.s32.totalorder %s1668_s3, %s1312_s23  ;;  %s56_s20 = int_to_ptr.vmem [resolvable:$true] %s55_s20 }
  0x37   :  { %p1316_p11 = scmp.lt.u32.totalorder %s1312_s23, %s1668_s3 }
  0x39   :  { %p1318_p12 = pnand %p1316_p11, %p1313_p10 }
  0x3b   :  { %1321 = shalt.err (!%p1318_p12)
}
  0x3c   :  { %s1322_s27 = scalar_lea.vmem %s56_s20, 1024  ;;  %p1327_p0 = scmp.lt.s32.totalorder %s56_s20, %s56_s20 }
  0x3d   :  { %p1323_p13 = scmp.ne.s32.totalorder %s56_s20, %s1322_s27  ;;  %p1328_p1 = scmp.lt.s32.totalorder %s1322_s27, %s1322_s27 }
  0x3f   :  { %p1329_p2 = por %p1328_p1, %p1327_p0 }
  0x41   :  { %p1330_p3 = pnand %p1329_p2, %p1323_p13 }
  0x43   :  { %1333 = shalt.err (!%p1330_p3)
}
  0x44   :  { %s1400_s2 = smov 512   ;;  %s1401_s18 = smov 32  }
  0x45   :  { %61 = dma.hbm_to_vmem [thread:$0]  %s1668_s3, 1024, %s56_s20, [#allocation13], %s1400_s2, %s1400_s2, %s1401_s18  }
  0x46   :  { %1378 = dma.done.wait [#allocation7], 64  }
  0x47   :  { %1379 = vsyncadd [#allocation7], 4294967232 }
  0x48   :  { %1380 = dma.done.wait [#allocation10], 2176  }
  0x49   :  { %1381 = vsyncadd [#allocation10], 4294965120 }
  0x4a   :  { %1382 = dma.done.wait [#allocation13], 1024  }
  0x4b   :  { %1383 = vsyncadd [#allocation13], 4294966272  ;;  %s79_s30 = sld [smem:[#allocation0]]   ;;  %91 = sst [smem:[#allocation16]] %s1400_s2  ;;  %v1402_v0 = vmov 0.0   ;;  %vm1403_vm0 = vmmov 0  }
  0x4c   :  { %1173 = vmatprep.subr.bf16.mxu1 %v1402_v0  ;;  %1175 = vmatprep.mubr.msk.bf16.mxu1 %vm1403_vm0, %v1402_v0  ;;  %93 = sst [smem:[#allocation16 + $0x1]] %s1400_s2  ;;  %s1404_s8 = smov [#allocation2]   ;;  %vm182_vm1 = vcmask 130048   ;;  %v1412_v26 = vmov 0  }
  0x4d   :  { %s87_s9 = sshll.u32 %s1404_s8, 4  ;;  %95 = sst [smem:[#allocation16 + $0x2]] %s1394_s12  ;;  %s88_s9 = int_to_ptr.vmem [resolvable:$true] %s87_s9 }
  0x4e   :  { %97 = sst [smem:[#allocation16 + $0x3]] %s1393_s11  ;;  %s1405_s13 = smov 2  }
  0x4f   :  { %99 = sst [smem:[#allocation16 + $0x4]] %s1397_s0  ;;  %s1406_s14 = smov 256  }
  0x50   :  { %105 = sst [smem:[#allocation16 + $0x7]] %s1393_s11  ;;  %s1407_s15 = smov [#allocation5]  }
  0x51   :  { %s1124_s3 = sshll.u32 %s79_s30, 26  ;;  %107 = sst [smem:[#allocation16 + $0x8]] %s1394_s12 }
  0x52   :  { %s1125_s10 = sadd.s32 134217728, %s1124_s3  ;;  %101 = sst [smem:[#allocation16 + $0x5]] %s1405_s13 }
  0x53   :  { %103 = sst [smem:[#allocation16 + $0x6]] %s1406_s14  ;;  %s1408_s16 = smov [#allocation15]  }
  0x54   :  { %109 = dma.general %s1669_s4, 8192, %s88_s9, %s1407_s15, %s1408_s16, [#allocation16], %s1125_s10, 0  }
  0x55   :  { %126 = sst [smem:[#allocation18]] %s1406_s14  ;;  %s1409_s20 = smov [#allocation3]  }
  0x56   :  { %128 = sst [smem:[#allocation18 + $0x1]] %s1406_s14  ;;  %s122_s21 = sshll.u32 %s1409_s20, 4  ;;  %s123_s21 = int_to_ptr.vmem [resolvable:$true] %s122_s21 }
  0x57   :  { %130 = sst [smem:[#allocation18 + $0x2]] %s1405_s13  ;;  %s1410_s22 = smov [#allocation5 + $0x1]  }
  0x58   :  { %132 = sst [smem:[#allocation18 + $0x3]] %s1393_s11  ;;  %s1411_s23 = smov [#allocation17]  }
  0x59   :  { %134 = sst [smem:[#allocation18 + $0x4]] %s1397_s0  ;;  %s1334_s26 = scalar_lea.hbm %s1671_s6, 2048 }
  0x5a   :  { %136 = sst [smem:[#allocation18 + $0x5]] %s1405_s13  ;;  %p1335_p4 = scmp.ne.s32.totalorder %s1671_s6, %s1334_s26 }
  0x5b   :  { %138 = sst [smem:[#allocation18 + $0x6]] %s1397_s0  ;;  %p1338_p5 = scmp.lt.u32.totalorder %s1334_s26, %s1671_s6 }
  0x5c   :  { %140 = sst [smem:[#allocation18 + $0x7]] %s1393_s11 }
  0x5d   :  { %142 = sst [smem:[#allocation18 + $0x8]] %s1394_s12  ;;  %p1340_p6 = pnand %p1338_p5, %p1335_p4 }
  0x5e   :  { %144 = dma.general %s1670_s5, 8192, %s123_s21, %s1410_s22, %s1411_s23, [#allocation18], %s1125_s10, 0  }
  0x5f   :  { %v1525_v1 = vld [vmem:[#allocation12 + $0x2] ss:$8 sm:$0xf]  ;;  %v1527_v2 = vld [vmem:[#allocation12 + $0x3] ss:$8 sm:$0xf] }
  0x60   :  { %v1529_v3 = vld [vmem:[#allocation12 + $0x4] ss:$8 sm:$0xf]  ;;  %v1531_v4 = vld [vmem:[#allocation12 + $0x5] ss:$8 sm:$0x3] }
  0x61   :  { %v1533_v5 = vld [vmem:[#allocation12 + $0x6] ss:$8 sm:$0x3]  ;;  %v1535_v6 = vld [vmem:[#allocation12 + $0x7] ss:$8 sm:$0x3] }
  0x62   :  { %v1537_v7 = vld [vmem:[#allocation12 + $0x20] ss:$0 sm:$0xff]  ;;  %v1209_v8 = vld [vmem:[#allocation9] sm:$0xff]   ;;  %v173_v9 = vld [vmem:[#allocation6] sm:$0xf]  ;;  %s1413_s5 = smov [#allocation4]  }
  0x63   :  { %v1212_v10 = vld [vmem:[#allocation11 + $0x4] ss:$8 sps:$4 sm:$0xff]   ;;  %1174 = vmatpush3.bf16.msra.mxu1 %v1209_v8  ;;  %v1210_v11 = vld [vmem:[#allocation11] ss:$8 sps:$4 sm:$0xff]   ;;  %v1215_v12 = vld [vmem:[#allocation11 + $0x14] ss:$8 sps:$4 sm:$0xff]  }
  0x64   :  { %335 = vmatprep.subr.bf16.mxu1 %v1212_v10  ;;  %v1213_v13 = vld [vmem:[#allocation11 + $0x10] ss:$8 sps:$4 sm:$0xff]   ;;  %v1218_v14 = vld [vmem:[#allocation11 + $0x24] ss:$8 sps:$4 sm:$0xff]   ;;  %v1216_v15 = vld [vmem:[#allocation11 + $0x20] ss:$8 sps:$4 sm:$0xff]  }
  0x65   :  { %v1221_v16 = vld [vmem:[#allocation11 + $0x34] ss:$8 sps:$4 sm:$0xff]   ;;  %v1219_v17 = vld [vmem:[#allocation11 + $0x30] ss:$8 sps:$4 sm:$0xff]   ;;  %v1224_v18 = vld [vmem:[#allocation11 + $0x44] ss:$8 sps:$4 sm:$0xff]  }
  0x66   :  { %1176 = vmatmul.mubr.msk.bf16.vlgmr.msra.gmra.mrb[0].mxu1 %vm182_vm1, %v173_v9  ;;  %v1222_v19 = vld [vmem:[#allocation11 + $0x40] ss:$8 sps:$4 sm:$0xff]   ;;  %v1227_v20 = vld [vmem:[#allocation11 + $0x54] ss:$8 sps:$4 sm:$0xff]   ;;  %v1225_v21 = vld [vmem:[#allocation11 + $0x50] ss:$8 sps:$4 sm:$0xff]  }
  0x67   :  { %336 = vmatpush1.bf16.msra.mxu1 %v1210_v11  ;;  %v1230_v22 = vld [vmem:[#allocation11 + $0x64] ss:$8 sps:$4 sm:$0xff]   ;;  %v1228_v23 = vld [vmem:[#allocation11 + $0x60] ss:$8 sps:$4 sm:$0xff]   ;;  %v1233_v24 = vld [vmem:[#allocation11 + $0x74] ss:$8 sps:$4 sm:$0xff]   ;;  %367 = vmatprep.mubr.bf16.mxu1 %v1412_v26 }
  0x68   :  { %337 = vmatprep.subr.bf16.mxu1 %v1215_v12  ;;  %v1231_v25 = vld [vmem:[#allocation11 + $0x70] ss:$8 sps:$4 sm:$0xff]   ;;  %v157_v27 = vld [vmem:[#allocation12] ss:$0 sm:$0xff]  ;;  %s153_s11 = sshll.u32 %s1413_s5, 4  ;;  %s154_s11 = int_to_ptr.vmem [resolvable:$true] %s153_s11 }
  0x6b   :  { %338 = vmatpush1.bf16.msra.mxu1 %v1213_v13 }
  0x6c   :  { %339 = vmatprep.subr.bf16.mxu1 %v1218_v14 }
  0x6f   :  { %340 = vmatpush1.bf16.msra.mxu1 %v1216_v15 }
  0x70   :  { %341 = vmatprep.subr.bf16.mxu1 %v1221_v16 }
  0x73   :  { %342 = vmatpush1.bf16.msra.mxu1 %v1219_v17 }
  0x74   :  { %343 = vmatprep.subr.bf16.mxu1 %v1224_v18 }
  0x77   :  { %344 = vmatpush1.bf16.msra.mxu1 %v1222_v19 }
  0x78   :  { %345 = vmatprep.subr.bf16.mxu1 %v1227_v20 }
  0x7b   :  { %346 = vmatpush1.bf16.msra.mxu1 %v1225_v21 }
  0x7c   :  { %347 = vmatprep.subr.bf16.mxu1 %v1230_v22 }
  0x7f   :  { %348 = vmatpush1.bf16.msra.mxu1 %v1228_v23 }
  0x80   :  { %349 = vmatprep.subr.bf16.mxu1 %v1233_v24 }
  0x83   :  { %350 = vmatpush1.bf16.msra.mxu1 %v1231_v25 }
 0x139   :  { %v220_v28 = vpop.f32.mrb[0].mxu1 }
 0x13a   :  { %v221_v29 = vadd.f32 %v220_v28, %v157_v27  ;;  %v1177_v30 = vpop.f32.mrb[1].mxu1 }
 0x13b   :  { %v223_v31 = vpop.f32.mrb[2].mxu1 }
 0x13c   :  { %v226_v32 = vmax.f32 %v221_v29, 0.0  ;;  %v1178_v33 = vpop.f32.mrb[3].mxu1 }
 0x13e   :  { %v243_v34 = vpack.c.bf16 %v226_v32, %v226_v32 }
 0x140   :  { %368 = vmatmul.mubr.bf16.vlgmr.msra.gmra.mrb[4].mxu1 %v243_v34 }
 0x141   :  { %1343 = shalt.err (!%p1340_p6)  }
 0x142   :  { %s1344_s18 = scalar_lea.vmem %s154_s11, 2048  ;;  %p1349_p8 = scmp.lt.s32.totalorder %s154_s11, %s154_s11 }
 0x143   :  { %p1345_p7 = scmp.ne.s32.totalorder %s154_s11, %s1344_s18  ;;  %p1350_p9 = scmp.lt.s32.totalorder %s1344_s18, %s1344_s18 }
 0x145   :  { %p1351_p10 = por %p1350_p9, %p1349_p8 }
 0x147   :  { %p1352_p11 = pnand %p1351_p10, %p1345_p7 }
 0x149   :  { %1355 = shalt.err (!%p1352_p11)  }
 0x14a   :  { %156 = dma.hbm_to_vmem [thread:$0]  %s1671_s6, 2048, %s154_s11, [#allocation5 + $0x2]  ;;  %v245_v35 = vlaneseq  ;;  %v159_v38 = vld [vmem:[#allocation12 + $0x1] ss:$8 sm:$0x3] }
 0x14c   :  { %v1551_v36 = vshrl.u32 %v245_v35, 7 }
 0x14e   :  { %v1554_v37 = vsub.s32 0, %v1551_v36  ;;  %v1557_v39 = vsub.s32 1, %v1551_v36 }
 0x150   :  { %v248_v40 = vrot.slane %v159_v38, %v1554_v37  ;;  %v252_v41 = vrot.slane %v159_v38, %v1557_v39 }
 0x213   :  { %v369_v42 = vpop.f32.mrb[4].mxu1 }
 0x214   :  { %v370_v43 = vadd.f32 %v369_v42, %v248_v40  ;;  %v371_v44 = vpop.f32.mrb[5].mxu1 }
 0x215   :  { %v372_v45 = vadd.f32 %v371_v44, %v252_v41  ;;  %v373_v46 = vpop.f32.mrb[6].mxu1 }
 0x216   :  { %v376_v47 = vmul.f32 0.01, %v370_v43  ;;  %v374_v48 = vpop.f32.mrb[7].mxu1 }
 0x217   :  { %v377_v49 = vmul.f32 0.01, %v372_v45 }
 0x218   :  { %v1561_v50 = vmax.f32 %v370_v43, %v376_v47 }
 0x219   :  { %v379_v51 = vmax.f32 %v372_v45, %v377_v49 }
 0x21a   :  { %1384 = dma.done.wait [#allocation5], 8192 }
 0x21b   :  { %1385 = vsyncadd [#allocation5], 4294959104  ;;  %v449_v52 = vpack.c.bf16 %v379_v51, %v379_v51  ;;  %v385_v53 = vld [vmem:[#allocation2 + $0x8] sm:$0xff]  ;;  %v387_v54 = vld [vmem:[#allocation2 + $0x18] sm:$0xff] }
 0x21c   :  { %v384_v55 = vld [vmem:[#allocation2] sm:$0xff]  ;;  %471 = vmatprep.subr.bf16.mxu0 %v385_v53  ;;  %512 = vmatprep.subr.bf16.mxu1 %v387_v54  ;;  %v386_v56 = vld [vmem:[#allocation2 + $0x10] sm:$0xff]  ;;  %v389_v57 = vld [vmem:[#allocation2 + $0x28] sm:$0xff] }
 0x21d   :  { %503 = vmatprep.mubr.bf16.mxu0 %v449_v52  ;;  %544 = vmatprep.mubr.bf16.mxu1 %v449_v52  ;;  %v391_v58 = vld [vmem:[#allocation2 + $0x38] sm:$0xff]  ;;  %v388_v59 = vld [vmem:[#allocation2 + $0x20] sm:$0xff]  ;;  %v390_v60 = vld [vmem:[#allocation2 + $0x30] sm:$0xff] }
 0x21e   :  { %472 = vmatpush1.bf16.msra.mxu0 %v384_v55  ;;  %513 = vmatpush1.bf16.msra.mxu1 %v386_v56  ;;  %v393_v61 = vld [vmem:[#allocation2 + $0x48] sm:$0xff]  ;;  %v395_v62 = vld [vmem:[#allocation2 + $0x58] sm:$0xff]  ;;  %v392_v63 = vld [vmem:[#allocation2 + $0x40] sm:$0xff] }
 0x21f   :  { %473 = vmatprep.subr.bf16.mxu0 %v389_v57  ;;  %514 = vmatprep.subr.bf16.mxu1 %v391_v58  ;;  %v394_v0 = vld [vmem:[#allocation2 + $0x50] sm:$0xff]  ;;  %v397_v8 = vld [vmem:[#allocation2 + $0x68] sm:$0xff]  ;;  %v399_v9 = vld [vmem:[#allocation2 + $0x78] sm:$0xff] }
 0x220   :  { %v396_v10 = vld [vmem:[#allocation2 + $0x60] sm:$0xff]  ;;  %v398_v11 = vld [vmem:[#allocation2 + $0x70] sm:$0xff]  ;;  %v401_v12 = vld [vmem:[#allocation2 + $0x88] sm:$0xff] }
 0x221   :  { %v403_v13 = vld [vmem:[#allocation2 + $0x98] sm:$0xff]  ;;  %v400_v14 = vld [vmem:[#allocation2 + $0x80] sm:$0xff]  ;;  %v402_v15 = vld [vmem:[#allocation2 + $0x90] sm:$0xff] }
 0x222   :  { %474 = vmatpush1.bf16.msra.mxu0 %v388_v59  ;;  %515 = vmatpush1.bf16.msra.mxu1 %v390_v60  ;;  %v405_v16 = vld [vmem:[#allocation2 + $0xa8] sm:$0xff]  ;;  %v407_v17 = vld [vmem:[#allocation2 + $0xb8] sm:$0xff]  ;;  %v404_v18 = vld [vmem:[#allocation2 + $0xa0] sm:$0xff] }
 0x223   :  { %475 = vmatprep.subr.bf16.mxu0 %v393_v61  ;;  %516 = vmatprep.subr.bf16.mxu1 %v395_v62  ;;  %v406_v19 = vld [vmem:[#allocation2 + $0xb0] sm:$0xff]  ;;  %v409_v20 = vld [vmem:[#allocation2 + $0xc8] sm:$0xff]  ;;  %v411_v21 = vld [vmem:[#allocation2 + $0xd8] sm:$0xff] }
 0x224   :  { %v408_v22 = vld [vmem:[#allocation2 + $0xc0] sm:$0xff]  ;;  %v410_v23 = vld [vmem:[#allocation2 + $0xd0] sm:$0xff]  ;;  %v413_v24 = vld [vmem:[#allocation2 + $0xe8] sm:$0xff] }
 0x225   :  { %v415_v25 = vld [vmem:[#allocation2 + $0xf8] sm:$0xff]  ;;  %v412_v26 = vld [vmem:[#allocation2 + $0xe0] sm:$0xff]  ;;  %v414_v27 = vld [vmem:[#allocation2 + $0xf0] sm:$0xff] }
 0x226   :  { %476 = vmatpush1.bf16.msra.mxu0 %v392_v63  ;;  %517 = vmatpush1.bf16.msra.mxu1 %v394_v0  ;;  %v417_v28 = vld [vmem:[#allocation2 + $0x108] sm:$0xff]  ;;  %v419_v29 = vld [vmem:[#allocation2 + $0x118] sm:$0xff]  ;;  %v416_v30 = vld [vmem:[#allocation2 + $0x100] sm:$0xff]  ;;  %v448_v0 = vpack.c.bf16 %v1561_v50, %v1561_v50 }
 0x227   :  { %477 = vmatprep.subr.bf16.mxu0 %v397_v8  ;;  %518 = vmatprep.subr.bf16.mxu1 %v399_v9  ;;  %v418_v31 = vld [vmem:[#allocation2 + $0x110] sm:$0xff]  ;;  %v421_v32 = vld [vmem:[#allocation2 + $0x128] sm:$0xff]  ;;  %v423_v33 = vld [vmem:[#allocation2 + $0x138] sm:$0xff]  ;;  %v1566_v8 = vsub.s32 2, %v1551_v36  ;;  %v1569_v9 = vsub.s32 3, %v1551_v36 }
 0x228   :  { %v420_v34 = vld [vmem:[#allocation2 + $0x120] sm:$0xff]  ;;  %v422_v35 = vld [vmem:[#allocation2 + $0x130] sm:$0xff]  ;;  %v425_v38 = vld [vmem:[#allocation2 + $0x148] sm:$0xff] }
 0x229   :  { %v427_v40 = vld [vmem:[#allocation2 + $0x158] sm:$0xff]  ;;  %v424_v41 = vld [vmem:[#allocation2 + $0x140] sm:$0xff]  ;;  %v426_v42 = vld [vmem:[#allocation2 + $0x150] sm:$0xff]  ;;  %v466_v50 = vrot.slane %v1525_v1, %v1569_v9 }
 0x22a   :  { %478 = vmatpush1.bf16.msra.mxu0 %v396_v10  ;;  %519 = vmatpush1.bf16.msra.mxu1 %v398_v11  ;;  %v429_v43 = vld [vmem:[#allocation2 + $0x168] sm:$0xff]  ;;  %v431_v44 = vld [vmem:[#allocation2 + $0x178] sm:$0xff]  ;;  %v428_v45 = vld [vmem:[#allocation2 + $0x160] sm:$0xff]  ;;  %v454_v10 = vrot.slane %v1525_v1, %v1554_v37  ;;  %v462_v11 = vrot.slane %v1525_v1, %v1566_v8 }
 0x22b   :  { %479 = vmatprep.subr.bf16.mxu0 %v401_v12  ;;  %520 = vmatprep.subr.bf16.mxu1 %v403_v13  ;;  %v430_v46 = vld [vmem:[#allocation2 + $0x170] sm:$0xff]  ;;  %v433_v47 = vld [vmem:[#allocation2 + $0x188] sm:$0xff]  ;;  %v435_v48 = vld [vmem:[#allocation2 + $0x198] sm:$0xff]  ;;  %v458_v12 = vrot.slane %v1525_v1, %v1557_v39 }
 0x22c   :  { %v432_v49 = vld [vmem:[#allocation2 + $0x180] sm:$0xff]  ;;  %v434_v51 = vld [vmem:[#allocation2 + $0x190] sm:$0xff]  ;;  %v437_v52 = vld [vmem:[#allocation2 + $0x1a8] sm:$0xff] }
 0x22d   :  { %v439_v53 = vld [vmem:[#allocation2 + $0x1b8] sm:$0xff]  ;;  %v436_v54 = vld [vmem:[#allocation2 + $0x1a0] sm:$0xff]  ;;  %v438_v55 = vld [vmem:[#allocation2 + $0x1b0] sm:$0xff] }
 0x22e   :  { %480 = vmatpush1.bf16.msra.mxu0 %v400_v14  ;;  %521 = vmatpush1.bf16.msra.mxu1 %v402_v15  ;;  %v441_v56 = vld [vmem:[#allocation2 + $0x1c8] sm:$0xff]  ;;  %v443_v57 = vld [vmem:[#allocation2 + $0x1d8] sm:$0xff]  ;;  %v440_v58 = vld [vmem:[#allocation2 + $0x1c0] sm:$0xff] }
 0x22f   :  { %481 = vmatprep.subr.bf16.mxu0 %v405_v16  ;;  %522 = vmatprep.subr.bf16.mxu1 %v407_v17  ;;  %v442_v59 = vld [vmem:[#allocation2 + $0x1d0] sm:$0xff]  ;;  %v445_v60 = vld [vmem:[#allocation2 + $0x1e8] sm:$0xff]  ;;  %v447_v61 = vld [vmem:[#allocation2 + $0x1f8] sm:$0xff] }
 0x230   :  { %v444_v62 = vld [vmem:[#allocation2 + $0x1e0] sm:$0xff]  ;;  %v446_v63 = vld [vmem:[#allocation2 + $0x1f0] sm:$0xff] }
 0x232   :  { %482 = vmatpush1.bf16.msra.mxu0 %v404_v18  ;;  %523 = vmatpush1.bf16.msra.mxu1 %v406_v19 }
 0x233   :  { %483 = vmatprep.subr.bf16.mxu0 %v409_v20  ;;  %524 = vmatprep.subr.bf16.mxu1 %v411_v21 }
 0x236   :  { %484 = vmatpush1.bf16.msra.mxu0 %v408_v22  ;;  %525 = vmatpush1.bf16.msra.mxu1 %v410_v23 }
 0x237   :  { %485 = vmatprep.subr.bf16.mxu0 %v413_v24  ;;  %526 = vmatprep.subr.bf16.mxu1 %v415_v25 }
 0x23a   :  { %486 = vmatpush1.bf16.msra.mxu0 %v412_v26  ;;  %527 = vmatpush1.bf16.msra.mxu1 %v414_v27 }
 0x23b   :  { %487 = vmatprep.subr.bf16.mxu0 %v417_v28  ;;  %528 = vmatprep.subr.bf16.mxu1 %v419_v29 }
 0x23e   :  { %488 = vmatpush1.bf16.msra.mxu0 %v416_v30  ;;  %529 = vmatpush1.bf16.msra.mxu1 %v418_v31 }
 0x23f   :  { %489 = vmatprep.subr.bf16.mxu0 %v421_v32  ;;  %530 = vmatprep.subr.bf16.mxu1 %v423_v33 }
 0x242   :  { %490 = vmatpush1.bf16.msra.mxu0 %v420_v34  ;;  %531 = vmatpush1.bf16.msra.mxu1 %v422_v35 }
 0x243   :  { %491 = vmatprep.subr.bf16.mxu0 %v425_v38  ;;  %532 = vmatprep.subr.bf16.mxu1 %v427_v40 }
 0x246   :  { %492 = vmatpush1.bf16.msra.mxu0 %v424_v41  ;;  %533 = vmatpush1.bf16.msra.mxu1 %v426_v42 }
 0x247   :  { %493 = vmatprep.subr.bf16.mxu0 %v429_v43  ;;  %534 = vmatprep.subr.bf16.mxu1 %v431_v44 }
 0x24a   :  { %494 = vmatpush1.bf16.msra.mxu0 %v428_v45  ;;  %535 = vmatpush1.bf16.msra.mxu1 %v430_v46 }
 0x24b   :  { %495 = vmatprep.subr.bf16.mxu0 %v433_v47  ;;  %536 = vmatprep.subr.bf16.mxu1 %v435_v48 }
 0x24e   :  { %496 = vmatpush1.bf16.msra.mxu0 %v432_v49  ;;  %537 = vmatpush1.bf16.msra.mxu1 %v434_v51 }
 0x24f   :  { %497 = vmatprep.subr.bf16.mxu0 %v437_v52  ;;  %538 = vmatprep.subr.bf16.mxu1 %v439_v53 }
 0x252   :  { %498 = vmatpush1.bf16.msra.mxu0 %v436_v54  ;;  %539 = vmatpush1.bf16.msra.mxu1 %v438_v55 }
 0x253   :  { %499 = vmatprep.subr.bf16.mxu0 %v441_v56  ;;  %540 = vmatprep.subr.bf16.mxu1 %v443_v57 }
 0x256   :  { %500 = vmatpush1.bf16.msra.mxu0 %v440_v58  ;;  %541 = vmatpush1.bf16.msra.mxu1 %v442_v59 }
 0x257   :  { %501 = vmatprep.subr.bf16.mxu0 %v445_v60  ;;  %542 = vmatprep.subr.bf16.mxu1 %v447_v61 }
 0x25a   :  { %502 = vmatpush1.bf16.msra.mxu0 %v444_v62  ;;  %543 = vmatpush1.bf16.msra.mxu1 %v446_v63 }
 0x25d   :  { %504 = vmatmul.mubr.bf16.vlgmr.msra.gmra.mrb[0].mxu0 %v448_v0  ;;  %545 = vmatmul.mubr.bf16.vlgmr.msra.gmra.mrb[8].mxu1 %v448_v0 }
 0x330   :  { %v505_v13 = vpop.f32.mrb[0].mxu0  ;;  %v546_v14 = vpop.f32.mrb[8].mxu1 }
 0x331   :  { %v506_v15 = vadd.f32 %v505_v13, %v454_v10  ;;  %v547_v16 = vadd.f32 %v546_v14, %v462_v11  ;;  %v507_v17 = vpop.f32.mrb[1].mxu0  ;;  %v548_v18 = vpop.f32.mrb[9].mxu1 }
 0x332   :  { %v508_v19 = vadd.f32 %v507_v17, %v458_v12  ;;  %v549_v20 = vadd.f32 %v548_v18, %v466_v50  ;;  %v509_v21 = vpop.f32.mrb[2].mxu0  ;;  %v550_v22 = vpop.f32.mrb[10].mxu1 }
 0x333   :  { %v1579_v23 = vmax.f32 %v506_v15, 0.0  ;;  %v1581_v24 = vmax.f32 %v547_v16, 0.0  ;;  %v510_v25 = vpop.f32.mrb[3].mxu0  ;;  %v551_v26 = vpop.f32.mrb[11].mxu1 }
 0x334   :  { %v1583_v27 = vmax.f32 %v508_v19, 0.0  ;;  %v1585_v28 = vmax.f32 %v549_v20, 0.0 }
 0x335   :  { %v557_v1 = vrot.slane %v1579_v23, 4  ;;  %v586_v29 = vmul.f32 %v1579_v23, %v1579_v23  ;;  %v569_v30 = vrot.slane %v1581_v24, 4  ;;  %v588_v31 = vmul.f32 %v1581_v24, %v1581_v24 }
 0x336   :  { %v563_v32 = vrot.slane %v1583_v27, 4  ;;  %v587_v33 = vmul.f32 %v1583_v27, %v1583_v27  ;;  %v575_v34 = vrot.slane %v1585_v28, 4  ;;  %v589_v35 = vmul.f32 %v1585_v28, %v1585_v28 }
 0x337   :  { %v558_v38 = vadd.f32 %v557_v1, %v1579_v23  ;;  %v590_v40 = vrot.slane %v586_v29, 4  ;;  %v570_v41 = vadd.f32 %v569_v30, %v1581_v24  ;;  %v602_v42 = vrot.slane %v588_v31, 4 }
 0x338   :  { %v564_v43 = vadd.f32 %v563_v32, %v1583_v27  ;;  %v596_v44 = vrot.slane %v587_v33, 4  ;;  %v576_v45 = vadd.f32 %v575_v34, %v1585_v28  ;;  %v608_v46 = vrot.slane %v589_v35, 4 }
 0x339   :  { %v559_v47 = vrot.slane %v558_v38, 2  ;;  %v591_v48 = vadd.f32 %v590_v40, %v586_v29  ;;  %v571_v49 = vrot.slane %v570_v41, 2  ;;  %v603_v51 = vadd.f32 %v602_v42, %v588_v31 }
 0x33a   :  { %v565_v52 = vrot.slane %v564_v43, 2  ;;  %v597_v53 = vadd.f32 %v596_v44, %v587_v33  ;;  %v577_v54 = vrot.slane %v576_v45, 2  ;;  %v609_v55 = vadd.f32 %v608_v46, %v589_v35 }
 0x33b   :  { %v560_v56 = vadd.f32 %v559_v47, %v558_v38  ;;  %v592_v57 = vrot.slane %v591_v48, 2  ;;  %v572_v58 = vadd.f32 %v571_v49, %v570_v41  ;;  %v604_v59 = vrot.slane %v603_v51, 2 }
 0x33c   :  { %v566_v60 = vadd.f32 %v565_v52, %v564_v43  ;;  %v598_v61 = vrot.slane %v597_v53, 2  ;;  %v578_v62 = vadd.f32 %v577_v54, %v576_v45  ;;  %v610_v63 = vrot.slane %v609_v55, 2 }
 0x33d   :  { %v561_v0 = vrot.slane %v560_v56, 1  ;;  %v593_v10 = vadd.f32 %v592_v57, %v591_v48  ;;  %v573_v11 = vrot.slane %v572_v58, 1  ;;  %v605_v12 = vadd.f32 %v604_v59, %v603_v51 }
 0x33e   :  { %v567_v50 = vrot.slane %v566_v60, 1  ;;  %v599_v13 = vadd.f32 %v598_v61, %v597_v53  ;;  %v579_v14 = vrot.slane %v578_v62, 1  ;;  %v611_v15 = vadd.f32 %v610_v63, %v609_v55 }
 0x33f   :  { %v562_v16 = vadd.f32 %v561_v0, %v560_v56  ;;  %v594_v17 = vrot.slane %v593_v10, 1  ;;  %v574_v18 = vadd.f32 %v573_v11, %v572_v58  ;;  %v606_v19 = vrot.slane %v605_v12, 1 }
 0x340   :  { %v568_v20 = vadd.f32 %v567_v50, %v566_v60  ;;  %v600_v21 = vrot.slane %v599_v13, 1  ;;  %v580_v22 = vadd.f32 %v579_v14, %v578_v62  ;;  %v612_v25 = vrot.slane %v611_v15, 1 }
 0x341   :  { %v582_v26 = vmul.f32 0.125, %v562_v16  ;;  %v595_v1 = vadd.f32 %v594_v17, %v593_v10  ;;  %v584_v29 = vmul.f32 0.125, %v574_v18  ;;  %v607_v30 = vadd.f32 %v606_v19, %v605_v12 }
 0x342   :  { %v583_v31 = vmul.f32 0.125, %v568_v20  ;;  %v601_v32 = vadd.f32 %v600_v21, %v599_v13  ;;  %v585_v33 = vmul.f32 0.125, %v580_v22  ;;  %v613_v34 = vadd.f32 %v612_v25, %v611_v15 }
 0x343   :  { %v614_v35 = vmul.f32 0.125, %v595_v1  ;;  %v618_v38 = vmul.f32 %v582_v26, %v582_v26  ;;  %v616_v40 = vmul.f32 0.125, %v607_v30  ;;  %v620_v41 = vmul.f32 %v584_v29, %v584_v29 }
 0x344   :  { %v615_v42 = vmul.f32 0.125, %v601_v32  ;;  %v619_v43 = vmul.f32 %v583_v31, %v583_v31  ;;  %v617_v44 = vmul.f32 0.125, %v613_v34  ;;  %v621_v45 = vmul.f32 %v585_v33, %v585_v33 }
 0x345   :  { %v622_v46 = vsub.f32 %v614_v35, %v618_v38  ;;  %v624_v47 = vsub.f32 %v616_v40, %v620_v41  ;;  %v1414_v59 = vmov 1966171168  }
 0x346   :  { %v623_v48 = vsub.f32 %v615_v42, %v619_v43  ;;  %v625_v49 = vsub.f32 %v617_v44, %v621_v45  ;;  %v645_v60 = vunpack.c.l.s4 %v1414_v59 }
 0x347   :  { %v626_v51 = vmax.f32 %v622_v46, 0.0  ;;  %v628_v52 = vmax.f32 %v624_v47, 0.0 }
 0x348   :  { %v627_v53 = vmax.f32 %v623_v48, 0.0  ;;  %v629_v54 = vmax.f32 %v625_v49, 0.0  ;;  %v646_v61 = vunpack.c.0.s8 %v645_v60 }
 0x349   :  { %v630_v55 = vadd.f32 1e-05, %v626_v51  ;;  %v632_v56 = vadd.f32 1e-05, %v628_v52 }
 0x34a   :  { %v631_v57 = vadd.f32 1e-05, %v627_v53  ;;  %v633_v58 = vadd.f32 1e-05, %v629_v54  ;;  %v1604_v0 = vsub.s32 %v646_v61, %v1551_v36 }
 0x34b   :  { %1234 = vrsqrt.f32 %v630_v55 }
 0x34c   :  { %1236 = vrsqrt.f32 %v632_v56 }
 0x34d   :  { %1238 = vrsqrt.f32 %v631_v57 }
 0x34e   :  { %1240 = vrsqrt.f32 %v633_v58 }
 0x355   :  { %v1235_v62 = vpop.eup %1234 }
 0x356   :  { %v1237_v63 = vpop.eup %1236 }
 0x357   :  { %v1239_v10 = vpop.eup %1238 }
 0x358   :  { %v1241_v11 = vpop.eup %1240  ;;  %v642_v12 = vcombine.low %v1235_v62, %v1239_v10 }
 0x359   :  { %v643_v50 = vcombine.low %v1237_v63, %v1241_v11 }
 0x35a   :  { %v650_v13 = vrot.slane %v642_v12, %v1604_v0 }
 0x35b   :  { %v657_v14 = vrot.slane %v643_v50, %v1604_v0 }
 0x35d   :  { %v658_v15 = vcombine.low %v650_v13, %v657_v14 }
 0x35f   :  { %v665_v16 = vrot.slane %v658_v15, %v1604_v0 }
 0x361   :  { %v667_v17 = vmul.f32 %v665_v16, %v1527_v2 }
 0x363   :  { %v672_v18 = vrot.slane %v667_v17, %v1554_v37  ;;  %v676_v19 = vrot.slane %v667_v17, %v1557_v39  ;;  %v680_v36 = vrot.slane %v667_v17, %v1566_v8  ;;  %v684_v20 = vrot.slane %v667_v17, %v1569_v9 }
 0x365   :  { %v689_v21 = vmul.f32 %v672_v18, %v1579_v23  ;;  %v690_v22 = vmul.f32 %v676_v19, %v1583_v27  ;;  %v691_v25 = vmul.f32 %v680_v36, %v1581_v24  ;;  %v692_v1 = vmul.f32 %v684_v20, %v1585_v28 }
 0x366   :  { %v693_v30 = vmul.f32 %v672_v18, %v582_v26  ;;  %v694_v32 = vmul.f32 %v676_v19, %v583_v31  ;;  %v695_v34 = vmul.f32 %v680_v36, %v584_v29  ;;  %v696_v2 = vmul.f32 %v684_v20, %v585_v33 }
 0x368   :  { %v701_v35 = vcombine.low %v693_v30, %v694_v32  ;;  %v702_v38 = vcombine.low %v695_v34, %v696_v2 }
 0x36a   :  { %v709_v40 = vrot.slane %v701_v35, %v1604_v0  ;;  %v716_v41 = vrot.slane %v702_v38, %v1604_v0 }
 0x36c   :  { %v717_v42 = vcombine.low %v709_v40, %v716_v41 }
 0x36e   :  { %v724_v43 = vrot.slane %v717_v42, %v1604_v0 }
 0x370   :  { %v726_v23 = vsub.f32 %v1529_v3, %v724_v43 }
 0x372   :  { %v731_v27 = vrot.slane %v726_v23, %v1554_v37  ;;  %v735_v24 = vrot.slane %v726_v23, %v1557_v39  ;;  %v739_v28 = vrot.slane %v726_v23, %v1566_v8  ;;  %v743_v26 = vrot.slane %v726_v23, %v1569_v9 }
 0x374   :  { %v1626_v29 = vadd.f32 %v731_v27, %v689_v21  ;;  %v749_v31 = vadd.f32 %v735_v24, %v690_v22  ;;  %v1628_v33 = vadd.f32 %v739_v28, %v691_v25  ;;  %v1630_v44 = vadd.f32 %v743_v26, %v692_v1 }
 0x375   :  { %1386 = dma.done.wait [#allocation5 + $0x1], 8192 }
 0x376   :  { %1387 = vsyncadd [#allocation5 + $0x1], 4294959104  ;;  %v821_v45 = vpack.c.bf16 %v749_v31, %v749_v31  ;;  %v757_v3 = vld [vmem:[#allocation3 + $0x8] sm:$0xff]  ;;  %v756_v46 = vld [vmem:[#allocation3] sm:$0xff]  ;;  %v820_v21 = vpack.c.bf16 %v1626_v29, %v1626_v29  ;;  %v823_v22 = vpack.c.bf16 %v1630_v44, %v1630_v44 }
 0x377   :  { %v759_v47 = vld [vmem:[#allocation3 + $0x18] sm:$0xff]  ;;  %835 = vmatprep.subr.bf16.mxu0 %v757_v3  ;;  %v758_v8 = vld [vmem:[#allocation3 + $0x10] sm:$0xff]  ;;  %v761_v48 = vld [vmem:[#allocation3 + $0x28] sm:$0xff] }
 0x378   :  { %867 = vmatprep.mubr.bf16.mxu0 %v821_v45  ;;  %836 = vmatpush1.bf16.msra.mxu0 %v756_v46  ;;  %v760_v9 = vld [vmem:[#allocation3 + $0x20] sm:$0xff]  ;;  %v763_v49 = vld [vmem:[#allocation3 + $0x38] sm:$0xff]  ;;  %v762_v51 = vld [vmem:[#allocation3 + $0x30] sm:$0xff] }
 0x379   :  { %837 = vmatprep.subr.bf16.mxu0 %v759_v47  ;;  %v765_v52 = vld [vmem:[#allocation3 + $0x48] sm:$0xff]  ;;  %v764_v53 = vld [vmem:[#allocation3 + $0x40] sm:$0xff]  ;;  %v767_v54 = vld [vmem:[#allocation3 + $0x58] sm:$0xff] }
 0x37a   :  { %v766_v55 = vld [vmem:[#allocation3 + $0x50] sm:$0xff]  ;;  %v769_v56 = vld [vmem:[#allocation3 + $0x68] sm:$0xff]  ;;  %v768_v57 = vld [vmem:[#allocation3 + $0x60] sm:$0xff] }
 0x37b   :  { %v771_v58 = vld [vmem:[#allocation3 + $0x78] sm:$0xff]  ;;  %v770_v59 = vld [vmem:[#allocation3 + $0x70] sm:$0xff]  ;;  %v773_v60 = vld [vmem:[#allocation3 + $0x88] sm:$0xff] }
 0x37c   :  { %838 = vmatpush1.bf16.msra.mxu0 %v758_v8  ;;  %v772_v61 = vld [vmem:[#allocation3 + $0x80] sm:$0xff]  ;;  %v775_v62 = vld [vmem:[#allocation3 + $0x98] sm:$0xff]  ;;  %v774_v63 = vld [vmem:[#allocation3 + $0x90] sm:$0xff] }
 0x37d   :  { %839 = vmatprep.subr.bf16.mxu0 %v761_v48  ;;  %v777_v10 = vld [vmem:[#allocation3 + $0xa8] sm:$0xff]  ;;  %v776_v11 = vld [vmem:[#allocation3 + $0xa0] sm:$0xff]  ;;  %v779_v12 = vld [vmem:[#allocation3 + $0xb8] sm:$0xff] }
 0x37e   :  { %v778_v50 = vld [vmem:[#allocation3 + $0xb0] sm:$0xff]  ;;  %v781_v13 = vld [vmem:[#allocation3 + $0xc8] sm:$0xff]  ;;  %v780_v14 = vld [vmem:[#allocation3 + $0xc0] sm:$0xff] }
 0x37f   :  { %v783_v15 = vld [vmem:[#allocation3 + $0xd8] sm:$0xff]  ;;  %v782_v16 = vld [vmem:[#allocation3 + $0xd0] sm:$0xff]  ;;  %v785_v17 = vld [vmem:[#allocation3 + $0xe8] sm:$0xff] }
 0x380   :  { %840 = vmatpush1.bf16.msra.mxu0 %v760_v9  ;;  %v784_v18 = vld [vmem:[#allocation3 + $0xe0] sm:$0xff]  ;;  %v787_v19 = vld [vmem:[#allocation3 + $0xf8] sm:$0xff]  ;;  %v786_v36 = vld [vmem:[#allocation3 + $0xf0] sm:$0xff] }
 0x381   :  { %841 = vmatprep.subr.bf16.mxu0 %v763_v49  ;;  %v789_v20 = vld [vmem:[#allocation3 + $0x108] sm:$0xff]  ;;  %v788_v25 = vld [vmem:[#allocation3 + $0x100] sm:$0xff]  ;;  %v791_v1 = vld [vmem:[#allocation3 + $0x118] sm:$0xff] }
 0x382   :  { %v790_v30 = vld [vmem:[#allocation3 + $0x110] sm:$0xff]  ;;  %v793_v32 = vld [vmem:[#allocation3 + $0x128] sm:$0xff]  ;;  %v792_v34 = vld [vmem:[#allocation3 + $0x120] sm:$0xff] }
 0x383   :  { %v795_v2 = vld [vmem:[#allocation3 + $0x138] sm:$0xff]  ;;  %v794_v35 = vld [vmem:[#allocation3 + $0x130] sm:$0xff]  ;;  %v797_v38 = vld [vmem:[#allocation3 + $0x148] sm:$0xff] }
 0x384   :  { %842 = vmatpush1.bf16.msra.mxu0 %v762_v51  ;;  %v796_v40 = vld [vmem:[#allocation3 + $0x140] sm:$0xff]  ;;  %v799_v41 = vld [vmem:[#allocation3 + $0x158] sm:$0xff]  ;;  %v798_v42 = vld [vmem:[#allocation3 + $0x150] sm:$0xff] }
 0x385   :  { %843 = vmatprep.subr.bf16.mxu0 %v765_v52  ;;  %v801_v43 = vld [vmem:[#allocation3 + $0x168] sm:$0xff]  ;;  %v800_v23 = vld [vmem:[#allocation3 + $0x160] sm:$0xff]  ;;  %v803_v27 = vld [vmem:[#allocation3 + $0x178] sm:$0xff] }
 0x386   :  { %v802_v24 = vld [vmem:[#allocation3 + $0x170] sm:$0xff]  ;;  %v805_v28 = vld [vmem:[#allocation3 + $0x188] sm:$0xff]  ;;  %v804_v26 = vld [vmem:[#allocation3 + $0x180] sm:$0xff] }
 0x387   :  { %v807_v29 = vld [vmem:[#allocation3 + $0x198] sm:$0xff]  ;;  %v806_v31 = vld [vmem:[#allocation3 + $0x190] sm:$0xff]  ;;  %v809_v44 = vld [vmem:[#allocation3 + $0x1a8] sm:$0xff] }
 0x388   :  { %844 = vmatpush1.bf16.msra.mxu0 %v764_v53  ;;  %v808_v45 = vld [vmem:[#allocation3 + $0x1a0] sm:$0xff]  ;;  %v811_v3 = vld [vmem:[#allocation3 + $0x1b8] sm:$0xff]  ;;  %v810_v46 = vld [vmem:[#allocation3 + $0x1b0] sm:$0xff] }
 0x389   :  { %845 = vmatprep.subr.bf16.mxu0 %v767_v54  ;;  %v813_v47 = vld [vmem:[#allocation3 + $0x1c8] sm:$0xff]  ;;  %v812_v8 = vld [vmem:[#allocation3 + $0x1c0] sm:$0xff]  ;;  %v815_v48 = vld [vmem:[#allocation3 + $0x1d8] sm:$0xff]  ;;  %v822_v54 = vpack.c.bf16 %v1628_v33, %v1628_v33 }
 0x38a   :  { %v814_v9 = vld [vmem:[#allocation3 + $0x1d0] sm:$0xff]  ;;  %v817_v49 = vld [vmem:[#allocation3 + $0x1e8] sm:$0xff]  ;;  %v816_v51 = vld [vmem:[#allocation3 + $0x1e0] sm:$0xff] }
 0x38b   :  { %v819_v52 = vld [vmem:[#allocation3 + $0x1f8] sm:$0xff]  ;;  %v818_v53 = vld [vmem:[#allocation3 + $0x1f0] sm:$0xff] }
 0x38c   :  { %846 = vmatpush1.bf16.msra.mxu0 %v766_v55  ;;  %v828_v55 = vrot.slane %v1531_v4, %v1554_v37 }
 0x38d   :  { %847 = vmatprep.subr.bf16.mxu0 %v769_v56  ;;  %v832_v56 = vrot.slane %v1531_v4, %v1557_v39 }
 0x390   :  { %848 = vmatpush1.bf16.msra.mxu0 %v768_v57 }
 0x391   :  { %849 = vmatprep.subr.bf16.mxu0 %v771_v58 }
 0x394   :  { %850 = vmatpush1.bf16.msra.mxu0 %v770_v59 }
 0x395   :  { %851 = vmatprep.subr.bf16.mxu0 %v773_v60 }
 0x398   :  { %852 = vmatpush1.bf16.msra.mxu0 %v772_v61 }
 0x399   :  { %853 = vmatprep.subr.bf16.mxu0 %v775_v62 }
 0x39c   :  { %854 = vmatpush1.bf16.msra.mxu0 %v774_v63 }
 0x39d   :  { %855 = vmatprep.subr.bf16.mxu0 %v777_v10 }
 0x3a0   :  { %856 = vmatpush1.bf16.msra.mxu0 %v776_v11 }
 0x3a1   :  { %857 = vmatprep.subr.bf16.mxu0 %v779_v12 }
 0x3a4   :  { %858 = vmatpush1.bf16.msra.mxu0 %v778_v50 }
 0x3a5   :  { %859 = vmatprep.subr.bf16.mxu0 %v781_v13 }
 0x3a8   :  { %860 = vmatpush1.bf16.msra.mxu0 %v780_v14 }
 0x3a9   :  { %861 = vmatprep.subr.bf16.mxu0 %v783_v15 }
 0x3ac   :  { %862 = vmatpush1.bf16.msra.mxu0 %v782_v16 }
 0x3ad   :  { %863 = vmatprep.subr.bf16.mxu0 %v785_v17 }
 0x3b0   :  { %864 = vmatpush1.bf16.msra.mxu0 %v784_v18 }
 0x3b1   :  { %865 = vmatprep.subr.bf16.mxu0 %v787_v19 }
 0x3b4   :  { %866 = vmatpush1.bf16.msra.mxu0 %v786_v36 }
 0x3b5   :  { %876 = vmatprep.subr.bf16.mxu0 %v789_v20 }
 0x3b7   :  { %868 = vmatmul.mubr.bf16.vlgmr.msra.gmra.mrb[4].mxu0 %v820_v21 }
 0x3b8   :  { %877 = vmatpush1.bf16.msra.mxu0 %v788_v25  ;;  %908 = vmatprep.mubr.bf16.mxu0 %v823_v22 }
 0x3b9   :  { %878 = vmatprep.subr.bf16.mxu0 %v791_v1 }
 0x3bc   :  { %879 = vmatpush1.bf16.msra.mxu0 %v790_v30 }
 0x3bd   :  { %880 = vmatprep.subr.bf16.mxu0 %v793_v32 }
 0x3c0   :  { %881 = vmatpush1.bf16.msra.mxu0 %v792_v34 }
 0x3c1   :  { %882 = vmatprep.subr.bf16.mxu0 %v795_v2 }
 0x3c4   :  { %883 = vmatpush1.bf16.msra.mxu0 %v794_v35 }
 0x3c5   :  { %884 = vmatprep.subr.bf16.mxu0 %v797_v38 }
 0x3c8   :  { %885 = vmatpush1.bf16.msra.mxu0 %v796_v40 }
 0x3c9   :  { %886 = vmatprep.subr.bf16.mxu0 %v799_v41 }
 0x3cc   :  { %887 = vmatpush1.bf16.msra.mxu0 %v798_v42 }
 0x3cd   :  { %888 = vmatprep.subr.bf16.mxu0 %v801_v43 }
 0x3d0   :  { %889 = vmatpush1.bf16.msra.mxu0 %v800_v23 }
 0x3d1   :  { %890 = vmatprep.subr.bf16.mxu0 %v803_v27 }
 0x3d4   :  { %891 = vmatpush1.bf16.msra.mxu0 %v802_v24 }
 0x3d5   :  { %892 = vmatprep.subr.bf16.mxu0 %v805_v28 }
 0x3d8   :  { %893 = vmatpush1.bf16.msra.mxu0 %v804_v26 }
 0x3d9   :  { %894 = vmatprep.subr.bf16.mxu0 %v807_v29 }
 0x3dc   :  { %895 = vmatpush1.bf16.msra.mxu0 %v806_v31 }
 0x3dd   :  { %896 = vmatprep.subr.bf16.mxu0 %v809_v44 }
 0x3e0   :  { %897 = vmatpush1.bf16.msra.mxu0 %v808_v45 }
 0x3e1   :  { %898 = vmatprep.subr.bf16.mxu0 %v811_v3 }
 0x3e4   :  { %899 = vmatpush1.bf16.msra.mxu0 %v810_v46 }
 0x3e5   :  { %900 = vmatprep.subr.bf16.mxu0 %v813_v47 }
 0x3e8   :  { %901 = vmatpush1.bf16.msra.mxu0 %v812_v8 }
 0x3e9   :  { %902 = vmatprep.subr.bf16.mxu0 %v815_v48 }
 0x3ec   :  { %903 = vmatpush1.bf16.msra.mxu0 %v814_v9 }
 0x3ed   :  { %904 = vmatprep.subr.bf16.mxu0 %v817_v49 }
 0x3f0   :  { %905 = vmatpush1.bf16.msra.mxu0 %v816_v51 }
 0x3f1   :  { %906 = vmatprep.subr.bf16.mxu0 %v819_v52 }
 0x3f4   :  { %907 = vmatpush1.bf16.msra.mxu0 %v818_v53 }
 0x3f7   :  { %909 = vmatmul.mubr.bf16.vlgmr.msra.gmra.mrb[4].mxu0 %v822_v54 }
 0x4ca   :  { %v910_v57 = vpop.f32.mrb[4].mxu0 }
 0x4cb   :  { %v1179_v58 = vadd.f32 %v910_v57, %v828_v55  ;;  %v912_v59 = vpop.f32.mrb[5].mxu0 }
 0x4cc   :  { %v1180_v60 = vadd.f32 %v912_v59, %v832_v56  ;;  %v914_v61 = vpop.f32.mrb[6].mxu0 }
 0x4cd   :  { %v917_v62 = vmax.f32 %v1179_v58, 0.0  ;;  %v915_v63 = vpop.f32.mrb[7].mxu0 }
 0x4ce   :  { %v918_v10 = vmax.f32 %v1180_v60, 0.0 }
 0x4cf   :  { %v919_v11 = vrot.slane %v917_v62, 4  ;;  %v933_v12 = vmul.f32 %v917_v62, %v917_v62 }
 0x4d0   :  { %v925_v50 = vrot.slane %v918_v10, 4  ;;  %v934_v33 = vmul.f32 %v918_v10, %v918_v10 }
 0x4d1   :  { %v920_v13 = vadd.f32 %v919_v11, %v917_v62  ;;  %v935_v14 = vrot.slane %v933_v12, 4 }
 0x4d2   :  { %v926_v15 = vadd.f32 %v925_v50, %v918_v10  ;;  %v941_v16 = vrot.slane %v934_v33, 4 }
 0x4d3   :  { %v921_v17 = vrot.slane %v920_v13, 2  ;;  %v936_v18 = vadd.f32 %v935_v14, %v933_v12 }
 0x4d4   :  { %v927_v19 = vrot.slane %v926_v15, 2  ;;  %v942_v4 = vadd.f32 %v941_v16, %v934_v33 }
 0x4d5   :  { %v922_v36 = vadd.f32 %v921_v17, %v920_v13  ;;  %v937_v20 = vrot.slane %v936_v18, 2 }
 0x4d6   :  { %v928_v21 = vadd.f32 %v927_v19, %v926_v15  ;;  %v943_v22 = vrot.slane %v942_v4, 2 }
 0x4d7   :  { %v923_v25 = vrot.slane %v922_v36, 1  ;;  %v938_v1 = vadd.f32 %v937_v20, %v936_v18 }
 0x4d8   :  { %v929_v30 = vrot.slane %v928_v21, 1  ;;  %v944_v32 = vadd.f32 %v943_v22, %v942_v4 }
 0x4d9   :  { %v924_v34 = vadd.f32 %v923_v25, %v922_v36  ;;  %v939_v2 = vrot.slane %v938_v1, 1 }
 0x4da   :  { %v930_v35 = vadd.f32 %v929_v30, %v928_v21  ;;  %v945_v38 = vrot.slane %v944_v32, 1 }
 0x4db   :  { %v931_v40 = vmul.f32 0.125, %v924_v34  ;;  %v940_v41 = vadd.f32 %v939_v2, %v938_v1 }
 0x4dc   :  { %v932_v42 = vmul.f32 0.125, %v930_v35  ;;  %v946_v43 = vadd.f32 %v945_v38, %v944_v32 }
 0x4dd   :  { %v947_v23 = vmul.f32 0.125, %v940_v41  ;;  %v949_v27 = vmul.f32 %v931_v40, %v931_v40 }
 0x4de   :  { %v948_v24 = vmul.f32 0.125, %v946_v43  ;;  %v950_v28 = vmul.f32 %v932_v42, %v932_v42 }
 0x4df   :  { %v951_v26 = vsub.f32 %v947_v23, %v949_v27 }
 0x4e0   :  { %v952_v29 = vsub.f32 %v948_v24, %v950_v28 }
 0x4e1   :  { %v953_v31 = vmax.f32 %v951_v26, 0.0 }
 0x4e2   :  { %v954_v44 = vmax.f32 %v952_v29, 0.0 }
 0x4e3   :  { %v955_v45 = vadd.f32 1e-05, %v953_v31 }
 0x4e4   :  { %v956_v3 = vadd.f32 1e-05, %v954_v44 }
 0x4e5   :  { %1242 = vrsqrt.f32 %v955_v45 }
 0x4e6   :  { %1244 = vrsqrt.f32 %v956_v3 }
 0x4ef   :  { %v1243_v46 = vpop.eup %1242 }
 0x4f0   :  { %v1245_v47 = vpop.eup %1244 }
 0x4f1   :  { %v961_v8 = vcombine.low %v1243_v46, %v1245_v47 }
 0x4f3   :  { %v968_v48 = vrot.slane %v961_v8, %v1604_v0 }
 0x4f5   :  { %v975_v9 = vrot.slane %v968_v48, %v1604_v0 }
 0x4f7   :  { %v977_v49 = vmul.f32 %v975_v9, %v1533_v5 }
 0x4f9   :  { %v982_v51 = vrot.slane %v977_v49, %v1554_v37  ;;  %v986_v52 = vrot.slane %v977_v49, %v1557_v39 }
 0x4fb   :  { %v989_v53 = vmul.f32 %v982_v51, %v917_v62  ;;  %v990_v54 = vmul.f32 %v986_v52, %v918_v10  ;;  %v991_v55 = vmul.f32 %v982_v51, %v931_v40  ;;  %v992_v56 = vmul.f32 %v986_v52, %v932_v42 }
 0x4fd   :  { %v995_v57 = vcombine.low %v991_v55, %v992_v56 }
 0x4ff   :  { %v1002_v58 = vrot.slane %v995_v57, %v1604_v0 }
 0x501   :  { %v1009_v59 = vrot.slane %v1002_v58, %v1604_v0 }
 0x503   :  { %v1011_v60 = vsub.f32 %v1535_v6, %v1009_v59 }
 0x505   :  { %v1016_v61 = vrot.slane %v1011_v60, %v1554_v37  ;;  %v1020_v63 = vrot.slane %v1011_v60, %v1557_v39 }
 0x507   :  { %v1023_v5 = vadd.f32 %v1016_v61, %v989_v53  ;;  %v1024_v11 = vadd.f32 %v1020_v63, %v990_v54 }
 0x508   :  { %1388 = dma.done.wait [#allocation5 + $0x2], 2048 }
 0x509   :  { %1389 = vsyncadd [#allocation5 + $0x2], 4294965248  ;;  %v1045_v12 = vpack.c.bf16 %v1024_v11, %v1024_v11  ;;  %v1036_v62 = vld [vmem:[#allocation4 + $0x40] sm:$0xff]  ;;  %v1037_v50 = vld [vmem:[#allocation4 + $0x48] sm:$0xff]  ;;  %v1044_v36 = vpack.c.bf16 %v1023_v5, %v1023_v5  ;;  %s1415_s6 = smov [#allocation14]  }
 0x50a   :  { %v1028_v10 = vld [vmem:[#allocation4] sm:$0xff]  ;;  %1151 = vmatprep.subr.bf16.mxu1 %v1036_v62  ;;  %v1029_v33 = vld [vmem:[#allocation4 + $0x8] sm:$0xff]  ;;  %v1038_v0 = vld [vmem:[#allocation4 + $0x50] sm:$0xff]  ;;  %s1093_s30 = sshll.u32 %s1415_s6, 4  ;;  %s1094_s30 = int_to_ptr.vmem [resolvable:$true] %s1093_s30 }
 0x50b   :  { %1078 = vmatprep.mubr.bf16.mxu1 %v1045_v12  ;;  %1152 = vmatpush3.bf16.msra.mxu1 %v1028_v10  ;;  %v1030_v6 = vld [vmem:[#allocation4 + $0x10] sm:$0xff]  ;;  %v1039_v37 = vld [vmem:[#allocation4 + $0x58] sm:$0xff]  ;;  %v1040_v13 = vld [vmem:[#allocation4 + $0x60] sm:$0xff]  ;;  %s1356_s8 = scalar_lea.vmem %s1094_s30, 128  ;;  %p1361_p13 = scmp.lt.s32.totalorder %s1094_s30, %s1094_s30 }
 0x50c   :  { %1153 = vmatprep.subr.bf16.mxu1 %v1037_v50  ;;  %v1031_v39 = vld [vmem:[#allocation4 + $0x18] sm:$0xff]  ;;  %v1032_v14 = vld [vmem:[#allocation4 + $0x20] sm:$0xff]  ;;  %v1041_v15 = vld [vmem:[#allocation4 + $0x68] sm:$0xff]  ;;  %p1357_p12 = scmp.ne.s32.totalorder %s1094_s30, %s1356_s8  ;;  %p1362_p0 = scmp.lt.s32.totalorder %s1356_s8, %s1356_s8 }
 0x50d   :  { %v1033_v16 = vld [vmem:[#allocation4 + $0x28] sm:$0xff]  ;;  %v1042_v17 = vld [vmem:[#allocation4 + $0x70] sm:$0xff]  ;;  %v1043_v19 = vld [vmem:[#allocation4 + $0x78] sm:$0xff] }
 0x50e   :  { %v1034_v18 = vld [vmem:[#allocation4 + $0x30] sm:$0xff]  ;;  %v1035_v4 = vld [vmem:[#allocation4 + $0x38] sm:$0xff]  ;;  %p1363_p1 = por %p1362_p0, %p1361_p13 }
 0x50f   :  { %1154 = vmatpush3.bf16.msra.mxu1 %v1029_v33 }
 0x510   :  { %1155 = vmatprep.subr.bf16.mxu1 %v1038_v0  ;;  %p1364_p2 = pnand %p1363_p1, %p1357_p12 }
 0x513   :  { %1156 = vmatpush3.bf16.msra.mxu1 %v1030_v6 }
 0x514   :  { %1157 = vmatprep.subr.bf16.mxu1 %v1039_v37 }
 0x517   :  { %1158 = vmatpush3.bf16.msra.mxu1 %v1031_v39 }
 0x518   :  { %1159 = vmatprep.subr.bf16.mxu1 %v1040_v13 }
 0x51b   :  { %1160 = vmatpush3.bf16.msra.mxu1 %v1032_v14 }
 0x51c   :  { %1161 = vmatprep.subr.bf16.mxu1 %v1041_v15 }
 0x51f   :  { %1162 = vmatpush3.bf16.msra.mxu1 %v1033_v16 }
 0x520   :  { %1163 = vmatprep.subr.bf16.mxu1 %v1042_v17 }
 0x523   :  { %1164 = vmatpush3.bf16.msra.mxu1 %v1034_v18 }
 0x524   :  { %1165 = vmatprep.subr.bf16.mxu1 %v1043_v19 }
 0x527   :  { %1166 = vmatpush3.bf16.msra.mxu1 %v1035_v4 }
 0x52a   :  { %1079 = vmatmul.mubr.bf16.vlgmr.msra.gmra.mrb[12].mxu1 %v1044_v36 }
 0x5fd   :  { %v1167_v20 = vpop.f32.mrb[12].mxu1 }
 0x5fe   :  { %v1168_v21 = vpop.f32.mrb[13].mxu1 }
 0x5ff   :  { %v1169_v22 = vadd.f32 %v1168_v21, %v1167_v20  ;;  %v1170_v25 = vpop.f32.mrb[14].mxu1 }
 0x600   :  { %v1171_v1 = vpop.f32.mrb[15].mxu1 }
 0x601   :  { %v1081_v30 = vadd.f32 %v1169_v22, %v1537_v7 }
 0x603   :  { %1086 = vst [vmem:[#allocation14] sm:$0xff] %v1081_v30 }
 0x604   :  { %1367 = shalt.err (!%p1364_p2)
}
 0x605   :  { %s1368_s10 = scalar_lea.hbm %s1672_s7, 128 }
 0x606   :  { %p1369_p3 = scmp.ne.s32.totalorder %s1672_s7, %s1368_s10  ;;  %p1372_p4 = scmp.lt.u32.totalorder %s1368_s10, %s1672_s7 }
 0x608   :  { %p1374_p5 = pnand %p1372_p4, %p1369_p3 }
 0x60a   :  { %1377 = shalt.err (!%p1374_p5)
}
 0x60b   :  { %1096 = dma.vmem_to_hbm [thread:$0]  %s1094_s30, 128, %s1672_s7, [#allocation8]  }
 0x60c   :  { %1390 = dma.done.wait [#allocation8], 128  }
 0x60d   :  { %1391 = vsyncadd [#allocation8], 4294967168 }
 0x60e   :  { %1100 = vsyncpa [#allocation7], 1 }
 0x60f   :  { %1101 = vsyncpa [#allocation10], 1 }
 0x610   :  { %1102 = vsyncpa [#allocation13], 1 }
 0x611   :  { %1103 = vsyncpa [#allocation8], 1 }
 0x612   :  { %1104 = vsyncmov [#allocation5] }
 0x615   :  { %s1105_s20 = vpop.sfrf %1104 }
 0x616   :  { %p1146_p6 = scmp.ne.s32.totalorder %s1105_s20, 0 }
 0x618   :  { %1109 = shalt.err (%p1146_p6)  }
 0x619   :  { %1111 = vsyncmov [#allocation5 + $0x1] }
 0x61c   :  { %s1112_s21 = vpop.sfrf %1111 }
 0x61d   :  { %p1147_p7 = scmp.ne.s32.totalorder %s1112_s21, 0 }
 0x61f   :  { %1116 = shalt.err (%p1147_p7)  }
 0x620   :  { %1118 = vsyncmov [#allocation5 + $0x2] }
 0x623   :  { %s1119_s22 = vpop.sfrf %1118 }
 0x624   :  { %p1148_p8 = scmp.ne.s32.totalorder %s1119_s22, 0 }
 0x626   :  { %1123 = shalt.err (%p1148_p8)  }

</bundles_post_ra>
